<compile_context>
chip_gen: v7x
topology: tpu7x:2x2x1
jax: 0.10.0
libtpu: 0.0.40
codegen_flags: <defaults>
</compile_context>

<pallas_src>
import jax
import jax.numpy as jnp
from jax.experimental import pallas as pl
from jax.experimental.pallas import tpu as pltpu

VOCAB_SIZE = 37    # 26 uppercase letters + 10 digits + 1 special '{'
SEQ_LEN = 10       # attention width: len(train_seq_tensor_li[0])
EMBED_SIZE = 32
HIDDEN_SIZE = 32

SEG = 32           # packed gate-segment width in the fused slabs (E == H == 32)
S_PAD = 16         # attention logits padded to an 8-multiple of lanes
V_EMB_PAD = 40     # embedding rows padded to an 8-multiple of sublanes
V_PAD = 128        # vocab logits padded to one full 128-lane tile


def _attention_decoder_kernel(
    # inputs (all VMEM-resident for the whole call)
    tok_ref,        # (T, 1) int32 token ids
    emb_ref,        # (V_EMB_PAD, E) embedding table (zero-padded rows)
    enc_out_ref,    # (S_PAD, H) encoder outputs (zero-padded rows)
    ctx0_ref,       # (1, H) initial context
    w_enc_ref,      # (E, 128)  [attn_we|0pad(32) | comb_we @ W_i(r|z|n) (96)]
    w_ctx_ref,      # (H, 128)  [attn_wh|0pad(32) | W_hr | W_hz | W_hn]
    w_attn_in_ref,  # (H, 96)   comb_wh @ W_i(r|z|n)
    w_lin_ref,      # (H, V_PAD) vocab projection (zero-padded cols)
    attn_b_ref,     # (1, S_PAD) attention bias, pad lanes = -1e30 (softmax mask)
    b_i_ref,        # (1, 96)   comb_b @ W_i(r|z|n) + [b_ir|b_iz|b_in]
    b_h_ref,        # (1, 96)   [b_hr|b_hz|b_hn]
    lin_b_ref,      # (1, V_PAD)
    # outputs
    out_ref,        # (T, V_PAD) logits, lane-dense slab (sliced to V in wrapper)
    ctx_out_ref,    # (1, H) final context
    # scratch
    h_scratch,      # VMEM (T, H) hidden states for the deferred vocab matmul
):
    T = h_scratch.shape[0]
    H = HIDDEN_SIZE

    # Embedding gather as a one-hot MXU matmul (no scalar reads, no OOB risk).
    tok = tok_ref[...]                                               # (T, 1) int32
    vocab_iota = jax.lax.broadcasted_iota(jnp.int32, (T, V_EMB_PAD), 1)
    one_hot = jnp.where(tok == vocab_iota, 1.0, 0.0).astype(jnp.float32)
    enc_all = jnp.dot(one_hot, emb_ref[...],
                      preferred_element_type=jnp.float32)            # (T, E)

    # Hoisted enc-side projection for every step at once (off the serial chain).
    enc_proj_all = jnp.dot(enc_all, w_enc_ref[...],
                           preferred_element_type=jnp.float32)       # (T, 128)

    # Sequential recurrence. T is static, so this Python loop is fully unrolled
    # (equivalent to lax.fori_loop(..., unroll=True) but with static indices).
    ctx = ctx0_ref[...]                                              # (1, H)
    for i in range(T):
        enc_row = enc_proj_all[i:i + 1, :]                           # (1, 128)
        ctx_proj = jnp.dot(ctx, w_ctx_ref[...],
                           preferred_element_type=jnp.float32)       # (1, 128)

        # attention softmax over S_PAD lanes (pad lanes masked with -1e30 bias)
        logits = enc_row[:, :S_PAD] + ctx_proj[:, :S_PAD] + attn_b_ref[...]
        logits = logits - jnp.max(logits, axis=-1, keepdims=True)
        exp_l = jnp.exp(logits)
        attn_weight = exp_l / jnp.sum(exp_l, axis=-1, keepdims=True)
        attn_applied = jnp.dot(attn_weight, enc_out_ref[...],
                               preferred_element_type=jnp.float32)   # (1, H)

        # GRU gates; attn_combine is folded into the input-side weights/bias.
        gates_i = (enc_row[:, SEG:]
                   + jnp.dot(attn_applied, w_attn_in_ref[...],
                             preferred_element_type=jnp.float32)
                   + b_i_ref[...])                                   # (1, 96)
        gates_h = ctx_proj[:, SEG:] + b_h_ref[...]                   # (1, 96)

        r = jax.nn.sigmoid(gates_i[:, :H] + gates_h[:, :H])
        z = jax.nn.sigmoid(gates_i[:, H:2 * H] + gates_h[:, H:2 * H])
        n = jnp.tanh(gates_i[:, 2 * H:] + r * gates_h[:, 2 * H:])
        h_new = (1.0 - z) * n + z * ctx

        h_scratch[pl.ds(i, 1), :] = h_new
        ctx = h_new

    ctx_out_ref[...] = ctx
    # Deferred vocab projection: one (T,H)@(H,128) matmul, unmasked lane-dense store.
    out_ref[...] = (jnp.dot(h_scratch[...], w_lin_ref[...],
                            preferred_element_type=jnp.float32)
                    + lin_b_ref[...])


@jax.jit
def attention_decoder_decode(tokens, context, encoder_output, packed):
    """Run T teacher-forced AttentionDecoder.forward steps in a single pallas_call.

    Returns (logits (T, 1, V), final context (1, H))."""
    num_steps = tokens.shape[0]
    enc_out_pad = jnp.pad(encoder_output, ((0, S_PAD - SEQ_LEN), (0, 0)))
    tok2d = tokens.reshape(num_steps, 1).astype(jnp.int32)

    vmem = lambda: pl.BlockSpec(memory_space=pltpu.MemorySpace.VMEM)
    out_pad, ctx_final = pl.pallas_call(
        _attention_decoder_kernel,
        out_shape=(
            jax.ShapeDtypeStruct((num_steps, V_PAD), jnp.float32),
            jax.ShapeDtypeStruct((1, HIDDEN_SIZE), jnp.float32),
        ),
        in_specs=[vmem() for _ in range(12)],
        out_specs=(vmem(), vmem()),
        scratch_shapes=[pltpu.VMEM((num_steps, HIDDEN_SIZE), jnp.float32)],
    )(
        tok2d, packed["emb"], enc_out_pad, context,
        packed["w_enc"], packed["w_ctx"], packed["w_attn_in"], packed["w_lin"],
        packed["attn_b"], packed["b_i"], packed["b_h"], packed["lin_b"],
    )
    logits = out_pad[:, :VOCAB_SIZE].reshape(num_steps, 1, VOCAB_SIZE)
    return logits, ctx_final


def init_params(key, embed_size=EMBED_SIZE, hidden_size=HIDDEN_SIZE,
                vocab_size=VOCAB_SIZE, seq_len=SEQ_LEN):
    """Deterministic init mirroring nn.Embedding / nn.Linear / nn.GRU shapes
    (stored transposed & split per concat-half / per gate). All keys distinct."""
    keys = jax.random.split(key, 21)
    e, h, v, s = embed_size, hidden_size, vocab_size, seq_len

    def unif(k, shape, fan_in):
        bound = 1.0 / jnp.sqrt(jnp.float32(fan_in))
        return jax.random.uniform(k, shape, jnp.float32, -bound, bound)

    p = {}
    p["embedding"] = jax.random.normal(keys[0], (v, e), jnp.float32)
    # nn.Linear(E+H, S) split into E-part / H-part
    p["attn_we"] = unif(keys[1], (e, s), e + h)
    p["attn_wh"] = unif(keys[2], (h, s), e + h)
    p["attn_b"] = unif(keys[3], (1, s), e + h)
    # nn.Linear(E+H, E) split likewise
    p["comb_we"] = unif(keys[4], (e, e), e + h)
    p["comb_wh"] = unif(keys[5], (h, e), e + h)
    p["comb_b"] = unif(keys[6], (1, e), e + h)
    # nn.GRU(E, H), per-gate (r, z, n)
    p["wir"] = unif(keys[7], (e, h), h)
    p["wiz"] = unif(keys[8], (e, h), h)
    p["win"] = unif(keys[9], (e, h), h)
    p["bir"] = unif(keys[10], (1, h), h)
    p["biz"] = unif(keys[11], (1, h), h)
    p["bin"] = unif(keys[12], (1, h), h)
    p["whr"] = unif(keys[13], (h, h), h)
    p["whz"] = unif(keys[14], (h, h), h)
    p["whn"] = unif(keys[15], (h, h), h)
    p["bhr"] = unif(keys[16], (1, h), h)
    p["bhz"] = unif(keys[17], (1, h), h)
    p["bhn"] = unif(keys[18], (1, h), h)
    # nn.Linear(H, vocab)
    p["lin_w"] = unif(keys[19], (h, v), h)
    p["lin_b"] = unif(keys[20], (1, v), h)
    return p


def pack_params(p):
    """Fuse / pad weights into compact, lane-aligned slabs (one-time host prep).

    Layout assumes E == H == SEG == 32:
      w_enc  (E,128) = [attn_we pad->32 | comb_we @ W_i(r|z|n)]
      w_ctx  (H,128) = [attn_wh pad->32 | W_hr | W_hz | W_hn]
    attn_combine is algebraically folded into the GRU input path."""
    w_in_all = jnp.concatenate([p["wir"], p["wiz"], p["win"]], axis=1)     # (E, 96)
    b_i_all = jnp.concatenate([p["bir"], p["biz"], p["bin"]], axis=1)      # (1, 96)
    b_h_all = jnp.concatenate([p["bhr"], p["bhz"], p["bhn"]], axis=1)      # (1, 96)

    attn_we_pad = jnp.pad(p["attn_we"], ((0, 0), (0, SEG - SEQ_LEN)))      # (E, 32)
    attn_wh_pad = jnp.pad(p["attn_wh"], ((0, 0), (0, SEG - SEQ_LEN)))      # (H, 32)
    attn_b_pad = jnp.pad(p["attn_b"], ((0, 0), (0, S_PAD - SEQ_LEN)),
                         constant_values=-1e30)                            # (1, 16)

    return {
        "emb": jnp.pad(p["embedding"], ((0, V_EMB_PAD - VOCAB_SIZE), (0, 0))),
        "w_enc": jnp.concatenate([attn_we_pad, p["comb_we"] @ w_in_all], axis=1),
        "w_ctx": jnp.concatenate([attn_wh_pad, p["whr"], p["whz"], p["whn"]], axis=1),
        "w_attn_in": p["comb_wh"] @ w_in_all,                              # (H, 96)
        "w_lin": jnp.pad(p["lin_w"], ((0, 0), (0, V_PAD - VOCAB_SIZE))),   # (H, 128)
        "attn_b": attn_b_pad,
        "b_i": p["comb_b"] @ w_in_all + b_i_all,                           # (1, 96)
        "b_h": b_h_all,
        "lin_b": jnp.pad(p["lin_b"], ((0, 0), (0, V_PAD - VOCAB_SIZE))),   # (1, 128)
    }


def reference_decode(tokens, context, encoder_output, p):
    """Pure-JAX reference of repeated AttentionDecoder.forward calls (unfused)."""
    def step(ctx, tok):
        enc = p["embedding"][tok][None, :]
        logits = enc @ p["attn_we"] + ctx @ p["attn_wh"] + p["attn_b"]
        w = jax.nn.softmax(logits, axis=-1)
        applied = w @ encoder_output
        comb = enc @ p["comb_we"] + applied @ p["comb_wh"] + p["comb_b"]
        i_r = comb @ p["wir"] + p["bir"]
        i_z = comb @ p["wiz"] + p["biz"]
        i_n = comb @ p["win"] + p["bin"]
        h_r = ctx @ p["whr"] + p["bhr"]
        h_z = ctx @ p["whz"] + p["bhz"]
        h_n = ctx @ p["whn"] + p["bhn"]
        r = jax.nn.sigmoid(i_r + h_r)
        z = jax.nn.sigmoid(i_z + h_z)
        n = jnp.tanh(i_n + r * h_n)
        h_new = (1.0 - z) * n + z * ctx
        out = h_new @ p["lin_w"] + p["lin_b"]
        return h_new, out

    ctx_final, outs = jax.lax.scan(step, context, tokens)
    return outs, ctx_final


if __name__ == "__main__":
    key = jax.random.PRNGKey(0)
    k_param, k_enc, k_tok = jax.random.split(key, 3)

    params = init_params(k_param)
    packed = pack_params(params)

    # init_context(context): encoder_output (seq_len, hidden); context = last row.
    encoder_output = jax.random.normal(k_enc, (SEQ_LEN, HIDDEN_SIZE), jnp.float32)
    context = encoder_output[-1:, :]                              # (1, H)

    # Teacher-forced token ids: each id drives one forward() call (len(x) == 1).
    num_steps = 8
    tokens = jax.random.randint(k_tok, (num_steps,), 0, VOCAB_SIZE, dtype=jnp.int32)

    outputs, new_context = attention_decoder_decode(tokens, context, encoder_output, packed)
    jax.block_until_ready((outputs, new_context))

    ref_out, ref_ctx = reference_decode(tokens, context, encoder_output, params)

    assert outputs.shape == (num_steps, 1, VOCAB_SIZE)
    assert new_context.shape == (1, HIDDEN_SIZE)
    assert bool(jnp.all(jnp.isfinite(outputs)))
    assert bool(jnp.allclose(outputs, ref_out, atol=1e-3, rtol=1e-3))
    assert bool(jnp.allclose(new_context, ref_ctx, atol=1e-3, rtol=1e-3))
    print("KERNEL_OK")
</pallas_src>

<mosaic_0001>
module attributes {stable_mosaic.version = 11 : i64} {
  func.func @_attention_decoder_kernel(%arg0: memref<8x1xi32, #tpu.memory_space<vmem>>, %arg1: memref<40x32xf32, #tpu.memory_space<vmem>>, %arg2: memref<16x32xf32, #tpu.memory_space<vmem>>, %arg3: memref<1x32xf32, #tpu.memory_space<vmem>>, %arg4: memref<32x128xf32, #tpu.memory_space<vmem>>, %arg5: memref<32x128xf32, #tpu.memory_space<vmem>>, %arg6: memref<32x96xf32, #tpu.memory_space<vmem>>, %arg7: memref<32x128xf32, #tpu.memory_space<vmem>>, %arg8: memref<1x16xf32, #tpu.memory_space<vmem>>, %arg9: memref<1x96xf32, #tpu.memory_space<vmem>>, %arg10: memref<1x96xf32, #tpu.memory_space<vmem>>, %arg11: memref<1x128xf32, #tpu.memory_space<vmem>>, %arg12: memref<8x128xf32, #tpu.memory_space<vmem>>, %arg13: memref<1x32xf32, #tpu.memory_space<vmem>>, %arg14: memref<8x32xf32, #tpu.memory_space<vmem>>) attributes {dimension_semantics = [], scalar_prefetch = 0 : i64, scratch_operands = 1 : i64, tpu.core_type = #tpu.core_type<tc>} {
    %c0 = arith.constant 0 : index
    %c0_0 = arith.constant 0 : index
    %0 = vector.load %arg0[%c0, %c0_0] : memref<8x1xi32, #tpu.memory_space<vmem>>, vector<8x1xi32>
    %1 = tpu.iota {dimensions = array<i32: 1>} : vector<8x40xi32>
    %2 = vector.broadcast %0 : vector<8x1xi32> to vector<8x40xi32>
    %3 = arith.cmpi eq, %2, %1 : vector<8x40xi32>
    %cst = arith.constant 1.000000e+00 : f32
    %cst_1 = arith.constant 0.000000e+00 : f32
    %4 = vector.broadcast %cst : f32 to vector<8x40xf32>
    %5 = vector.broadcast %cst_1 : f32 to vector<8x40xf32>
    %6 = arith.select %3, %4, %5 : vector<8x40xi1>, vector<8x40xf32>
    %c0_2 = arith.constant 0 : index
    %c0_3 = arith.constant 0 : index
    %7 = vector.load %arg1[%c0_2, %c0_3] : memref<40x32xf32, #tpu.memory_space<vmem>>, vector<40x32xf32>
    %cst_4 = arith.constant dense<0.000000e+00> : vector<8x32xf32>
    %8 = tpu.matmul %6, %7, %cst_4 {dimension_numbers = #tpu.dot_dimension_numbers<[1], [0], [0], [1], [0, 0, 1, 1], [], []>} : vector<8x40xf32>, vector<40x32xf32>, vector<8x32xf32> -> vector<8x32xf32>
    %c0_5 = arith.constant 0 : index
    %c0_6 = arith.constant 0 : index
    %9 = vector.load %arg4[%c0_5, %c0_6] : memref<32x128xf32, #tpu.memory_space<vmem>>, vector<32x128xf32>
    %cst_7 = arith.constant dense<0.000000e+00> : vector<8x128xf32>
    %10 = tpu.matmul %8, %9, %cst_7 {dimension_numbers = #tpu.dot_dimension_numbers<[1], [0], [0], [1], [0, 0, 1, 1], [], []>} : vector<8x32xf32>, vector<32x128xf32>, vector<8x128xf32> -> vector<8x128xf32>
    %c0_8 = arith.constant 0 : index
    %c0_9 = arith.constant 0 : index
    %11 = vector.load %arg3[%c0_8, %c0_9] : memref<1x32xf32, #tpu.memory_space<vmem>>, vector<1x32xf32>
    %12 = vector.extract_strided_slice %10 {offsets = [0, 0], sizes = [1, 128], strides = [1, 1]} : vector<8x128xf32> to vector<1x128xf32>
    %c0_10 = arith.constant 0 : index
    %c0_11 = arith.constant 0 : index
    %13 = vector.load %arg5[%c0_10, %c0_11] : memref<32x128xf32, #tpu.memory_space<vmem>>, vector<32x128xf32>
    %cst_12 = arith.constant dense<0.000000e+00> : vector<1x128xf32>
    %14 = tpu.matmul %11, %13, %cst_12 {dimension_numbers = #tpu.dot_dimension_numbers<[1], [0], [0], [1], [0, 0, 1, 1], [], []>} : vector<1x32xf32>, vector<32x128xf32>, vector<1x128xf32> -> vector<1x128xf32>
    %15 = vector.extract_strided_slice %12 {offsets = [0, 0], sizes = [1, 16], strides = [1, 1]} : vector<1x128xf32> to vector<1x16xf32>
    %16 = vector.extract_strided_slice %14 {offsets = [0, 0], sizes = [1, 16], strides = [1, 1]} : vector<1x128xf32> to vector<1x16xf32>
    %17 = arith.addf %15, %16 : vector<1x16xf32>
    %c0_13 = arith.constant 0 : index
    %c0_14 = arith.constant 0 : index
    %18 = vector.load %arg8[%c0_13, %c0_14] : memref<1x16xf32, #tpu.memory_space<vmem>>, vector<1x16xf32>
    %19 = arith.addf %17, %18 : vector<1x16xf32>
    %cst_15 = arith.constant dense<0xFF800000> : vector<1xf32>
    %20 = vector.multi_reduction <maximumf>, %19, %cst_15 [1] : vector<1x16xf32> to vector<1xf32>
    %21 = vector.shape_cast %20 : vector<1xf32> to vector<1x1xf32>
    %22 = vector.broadcast %21 : vector<1x1xf32> to vector<1x16xf32>
    %23 = arith.subf %19, %22 : vector<1x16xf32>
    %24 = math.exp %23 : vector<1x16xf32>
    %cst_16 = arith.constant dense<0.000000e+00> : vector<1xf32>
    %25 = vector.multi_reduction <add>, %24, %cst_16 [1] : vector<1x16xf32> to vector<1xf32>
    %26 = vector.shape_cast %25 : vector<1xf32> to vector<1x1xf32>
    %27 = vector.broadcast %26 : vector<1x1xf32> to vector<1x16xf32>
    %28 = arith.divf %24, %27 : vector<1x16xf32>
    %c0_17 = arith.constant 0 : index
    %c0_18 = arith.constant 0 : index
    %29 = vector.load %arg2[%c0_17, %c0_18] : memref<16x32xf32, #tpu.memory_space<vmem>>, vector<16x32xf32>
    %cst_19 = arith.constant dense<0.000000e+00> : vector<1x32xf32>
    %30 = tpu.matmul %28, %29, %cst_19 {dimension_numbers = #tpu.dot_dimension_numbers<[1], [0], [0], [1], [0, 0, 1, 1], [], []>} : vector<1x16xf32>, vector<16x32xf32>, vector<1x32xf32> -> vector<1x32xf32>
    %31 = vector.extract_strided_slice %12 {offsets = [0, 32], sizes = [1, 96], strides = [1, 1]} : vector<1x128xf32> to vector<1x96xf32>
    %c0_20 = arith.constant 0 : index
    %c0_21 = arith.constant 0 : index
    %32 = vector.load %arg6[%c0_20, %c0_21] : memref<32x96xf32, #tpu.memory_space<vmem>>, vector<32x96xf32>
    %cst_22 = arith.constant dense<0.000000e+00> : vector<1x96xf32>
    %33 = tpu.matmul %30, %32, %cst_22 {dimension_numbers = #tpu.dot_dimension_numbers<[1], [0], [0], [1], [0, 0, 1, 1], [], []>} : vector<1x32xf32>, vector<32x96xf32>, vector<1x96xf32> -> vector<1x96xf32>
    %34 = arith.addf %31, %33 : vector<1x96xf32>
    %c0_23 = arith.constant 0 : index
    %c0_24 = arith.constant 0 : index
    %35 = vector.load %arg9[%c0_23, %c0_24] : memref<1x96xf32, #tpu.memory_space<vmem>>, vector<1x96xf32>
    %36 = arith.addf %34, %35 : vector<1x96xf32>
    %37 = vector.extract_strided_slice %14 {offsets = [0, 32], sizes = [1, 96], strides = [1, 1]} : vector<1x128xf32> to vector<1x96xf32>
    %c0_25 = arith.constant 0 : index
    %c0_26 = arith.constant 0 : index
    %38 = vector.load %arg10[%c0_25, %c0_26] : memref<1x96xf32, #tpu.memory_space<vmem>>, vector<1x96xf32>
    %39 = arith.addf %37, %38 : vector<1x96xf32>
    %40 = vector.extract_strided_slice %36 {offsets = [0, 0], sizes = [1, 32], strides = [1, 1]} : vector<1x96xf32> to vector<1x32xf32>
    %41 = vector.extract_strided_slice %39 {offsets = [0, 0], sizes = [1, 32], strides = [1, 1]} : vector<1x96xf32> to vector<1x32xf32>
    %42 = arith.addf %40, %41 : vector<1x32xf32>
    %43 = arith.negf %42 : vector<1x32xf32>
    %44 = math.exp %43 : vector<1x32xf32>
    %cst_27 = arith.constant 1.000000e+00 : f32
    %45 = vector.broadcast %cst_27 : f32 to vector<1x32xf32>
    %46 = arith.addf %45, %44 : vector<1x32xf32>
    %47 = arith.divf %45, %46 : vector<1x32xf32>
    %48 = vector.extract_strided_slice %36 {offsets = [0, 32], sizes = [1, 32], strides = [1, 1]} : vector<1x96xf32> to vector<1x32xf32>
    %49 = vector.extract_strided_slice %39 {offsets = [0, 32], sizes = [1, 32], strides = [1, 1]} : vector<1x96xf32> to vector<1x32xf32>
    %50 = arith.addf %48, %49 : vector<1x32xf32>
    %51 = arith.negf %50 : vector<1x32xf32>
    %52 = math.exp %51 : vector<1x32xf32>
    %cst_28 = arith.constant 1.000000e+00 : f32
    %53 = vector.broadcast %cst_28 : f32 to vector<1x32xf32>
    %54 = arith.addf %53, %52 : vector<1x32xf32>
    %55 = arith.divf %53, %54 : vector<1x32xf32>
    %56 = vector.extract_strided_slice %36 {offsets = [0, 64], sizes = [1, 32], strides = [1, 1]} : vector<1x96xf32> to vector<1x32xf32>
    %57 = vector.extract_strided_slice %39 {offsets = [0, 64], sizes = [1, 32], strides = [1, 1]} : vector<1x96xf32> to vector<1x32xf32>
    %58 = arith.mulf %47, %57 : vector<1x32xf32>
    %59 = arith.addf %56, %58 : vector<1x32xf32>
    %60 = math.tanh %59 : vector<1x32xf32>
    %cst_29 = arith.constant 1.000000e+00 : f32
    %61 = vector.broadcast %cst_29 : f32 to vector<1x32xf32>
    %62 = arith.subf %61, %55 : vector<1x32xf32>
    %63 = arith.mulf %62, %60 : vector<1x32xf32>
    %64 = arith.mulf %55, %11 : vector<1x32xf32>
    %65 = arith.addf %63, %64 : vector<1x32xf32>
    %c0_30 = arith.constant 0 : index
    %c0_31 = arith.constant 0 : index
    %66 = vector.load %arg14[%c0_30, %c0_31] : memref<8x32xf32, #tpu.memory_space<vmem>>, vector<1x32xf32>
    tpu.vector_store %arg14[%c0_30, %c0_31], %65 {strides = array<i32>} : memref<8x32xf32, #tpu.memory_space<vmem>>, vector<1x32xf32>,
    %67 = vector.extract_strided_slice %10 {offsets = [1, 0], sizes = [1, 128], strides = [1, 1]} : vector<8x128xf32> to vector<1x128xf32>
    %c0_32 = arith.constant 0 : index
    %c0_33 = arith.constant 0 : index
    %68 = vector.load %arg5[%c0_32, %c0_33] : memref<32x128xf32, #tpu.memory_space<vmem>>, vector<32x128xf32>
    %cst_34 = arith.constant dense<0.000000e+00> : vector<1x128xf32>
    %69 = tpu.matmul %65, %68, %cst_34 {dimension_numbers = #tpu.dot_dimension_numbers<[1], [0], [0], [1], [0, 0, 1, 1], [], []>} : vector<1x32xf32>, vector<32x128xf32>, vector<1x128xf32> -> vector<1x128xf32>
    %70 = vector.extract_strided_slice %67 {offsets = [0, 0], sizes = [1, 16], strides = [1, 1]} : vector<1x128xf32> to vector<1x16xf32>
    %71 = vector.extract_strided_slice %69 {offsets = [0, 0], sizes = [1, 16], strides = [1, 1]} : vector<1x128xf32> to vector<1x16xf32>
    %72 = arith.addf %70, %71 : vector<1x16xf32>
    %c0_35 = arith.constant 0 : index
    %c0_36 = arith.constant 0 : index
    %73 = vector.load %arg8[%c0_35, %c0_36] : memref<1x16xf32, #tpu.memory_space<vmem>>, vector<1x16xf32>
    %74 = arith.addf %72, %73 : vector<1x16xf32>
    %cst_37 = arith.constant dense<0xFF800000> : vector<1xf32>
    %75 = vector.multi_reduction <maximumf>, %74, %cst_37 [1] : vector<1x16xf32> to vector<1xf32>
    %76 = vector.shape_cast %75 : vector<1xf32> to vector<1x1xf32>
    %77 = vector.broadcast %76 : vector<1x1xf32> to vector<1x16xf32>
    %78 = arith.subf %74, %77 : vector<1x16xf32>
    %79 = math.exp %78 : vector<1x16xf32>
    %cst_38 = arith.constant dense<0.000000e+00> : vector<1xf32>
    %80 = vector.multi_reduction <add>, %79, %cst_38 [1] : vector<1x16xf32> to vector<1xf32>
    %81 = vector.shape_cast %80 : vector<1xf32> to vector<1x1xf32>
    %82 = vector.broadcast %81 : vector<1x1xf32> to vector<1x16xf32>
    %83 = arith.divf %79, %82 : vector<1x16xf32>
    %c0_39 = arith.constant 0 : index
    %c0_40 = arith.constant 0 : index
    %84 = vector.load %arg2[%c0_39, %c0_40] : memref<16x32xf32, #tpu.memory_space<vmem>>, vector<16x32xf32>
    %cst_41 = arith.constant dense<0.000000e+00> : vector<1x32xf32>
    %85 = tpu.matmul %83, %84, %cst_41 {dimension_numbers = #tpu.dot_dimension_numbers<[1], [0], [0], [1], [0, 0, 1, 1], [], []>} : vector<1x16xf32>, vector<16x32xf32>, vector<1x32xf32> -> vector<1x32xf32>
    %86 = vector.extract_strided_slice %67 {offsets = [0, 32], sizes = [1, 96], strides = [1, 1]} : vector<1x128xf32> to vector<1x96xf32>
    %c0_42 = arith.constant 0 : index
    %c0_43 = arith.constant 0 : index
    %87 = vector.load %arg6[%c0_42, %c0_43] : memref<32x96xf32, #tpu.memory_space<vmem>>, vector<32x96xf32>
    %cst_44 = arith.constant dense<0.000000e+00> : vector<1x96xf32>
    %88 = tpu.matmul %85, %87, %cst_44 {dimension_numbers = #tpu.dot_dimension_numbers<[1], [0], [0], [1], [0, 0, 1, 1], [], []>} : vector<1x32xf32>, vector<32x96xf32>, vector<1x96xf32> -> vector<1x96xf32>
    %89 = arith.addf %86, %88 : vector<1x96xf32>
    %c0_45 = arith.constant 0 : index
    %c0_46 = arith.constant 0 : index
    %90 = vector.load %arg9[%c0_45, %c0_46] : memref<1x96xf32, #tpu.memory_space<vmem>>, vector<1x96xf32>
    %91 = arith.addf %89, %90 : vector<1x96xf32>
    %92 = vector.extract_strided_slice %69 {offsets = [0, 32], sizes = [1, 96], strides = [1, 1]} : vector<1x128xf32> to vector<1x96xf32>
    %c0_47 = arith.constant 0 : index
    %c0_48 = arith.constant 0 : index
    %93 = vector.load %arg10[%c0_47, %c0_48] : memref<1x96xf32, #tpu.memory_space<vmem>>, vector<1x96xf32>
    %94 = arith.addf %92, %93 : vector<1x96xf32>
    %95 = vector.extract_strided_slice %91 {offsets = [0, 0], sizes = [1, 32], strides = [1, 1]} : vector<1x96xf32> to vector<1x32xf32>
    %96 = vector.extract_strided_slice %94 {offsets = [0, 0], sizes = [1, 32], strides = [1, 1]} : vector<1x96xf32> to vector<1x32xf32>
    %97 = arith.addf %95, %96 : vector<1x32xf32>
    %98 = arith.negf %97 : vector<1x32xf32>
    %99 = math.exp %98 : vector<1x32xf32>
    %cst_49 = arith.constant 1.000000e+00 : f32
    %100 = vector.broadcast %cst_49 : f32 to vector<1x32xf32>
    %101 = arith.addf %100, %99 : vector<1x32xf32>
    %102 = arith.divf %100, %101 : vector<1x32xf32>
    %103 = vector.extract_strided_slice %91 {offsets = [0, 32], sizes = [1, 32], strides = [1, 1]} : vector<1x96xf32> to vector<1x32xf32>
    %104 = vector.extract_strided_slice %94 {offsets = [0, 32], sizes = [1, 32], strides = [1, 1]} : vector<1x96xf32> to vector<1x32xf32>
    %105 = arith.addf %103, %104 : vector<1x32xf32>
    %106 = arith.negf %105 : vector<1x32xf32>
    %107 = math.exp %106 : vector<1x32xf32>
    %cst_50 = arith.constant 1.000000e+00 : f32
    %108 = vector.broadcast %cst_50 : f32 to vector<1x32xf32>
    %109 = arith.addf %108, %107 : vector<1x32xf32>
    %110 = arith.divf %108, %109 : vector<1x32xf32>
    %111 = vector.extract_strided_slice %91 {offsets = [0, 64], sizes = [1, 32], strides = [1, 1]} : vector<1x96xf32> to vector<1x32xf32>
    %112 = vector.extract_strided_slice %94 {offsets = [0, 64], sizes = [1, 32], strides = [1, 1]} : vector<1x96xf32> to vector<1x32xf32>
    %113 = arith.mulf %102, %112 : vector<1x32xf32>
    %114 = arith.addf %111, %113 : vector<1x32xf32>
    %115 = math.tanh %114 : vector<1x32xf32>
    %cst_51 = arith.constant 1.000000e+00 : f32
    %116 = vector.broadcast %cst_51 : f32 to vector<1x32xf32>
    %117 = arith.subf %116, %110 : vector<1x32xf32>
    %118 = arith.mulf %117, %115 : vector<1x32xf32>
    %119 = arith.mulf %110, %65 : vector<1x32xf32>
    %120 = arith.addf %118, %119 : vector<1x32xf32>
    %c1 = arith.constant 1 : index
    %c0_52 = arith.constant 0 : index
    %121 = vector.load %arg14[%c1, %c0_52] : memref<8x32xf32, #tpu.memory_space<vmem>>, vector<1x32xf32>
    tpu.vector_store %arg14[%c1, %c0_52], %120 {strides = array<i32>} : memref<8x32xf32, #tpu.memory_space<vmem>>, vector<1x32xf32>,
    %122 = vector.extract_strided_slice %10 {offsets = [2, 0], sizes = [1, 128], strides = [1, 1]} : vector<8x128xf32> to vector<1x128xf32>
    %c0_53 = arith.constant 0 : index
    %c0_54 = arith.constant 0 : index
    %123 = vector.load %arg5[%c0_53, %c0_54] : memref<32x128xf32, #tpu.memory_space<vmem>>, vector<32x128xf32>
    %cst_55 = arith.constant dense<0.000000e+00> : vector<1x128xf32>
    %124 = tpu.matmul %120, %123, %cst_55 {dimension_numbers = #tpu.dot_dimension_numbers<[1], [0], [0], [1], [0, 0, 1, 1], [], []>} : vector<1x32xf32>, vector<32x128xf32>, vector<1x128xf32> -> vector<1x128xf32>
    %125 = vector.extract_strided_slice %122 {offsets = [0, 0], sizes = [1, 16], strides = [1, 1]} : vector<1x128xf32> to vector<1x16xf32>
    %126 = vector.extract_strided_slice %124 {offsets = [0, 0], sizes = [1, 16], strides = [1, 1]} : vector<1x128xf32> to vector<1x16xf32>
    %127 = arith.addf %125, %126 : vector<1x16xf32>
    %c0_56 = arith.constant 0 : index
    %c0_57 = arith.constant 0 : index
    %128 = vector.load %arg8[%c0_56, %c0_57] : memref<1x16xf32, #tpu.memory_space<vmem>>, vector<1x16xf32>
    %129 = arith.addf %127, %128 : vector<1x16xf32>
    %cst_58 = arith.constant dense<0xFF800000> : vector<1xf32>
    %130 = vector.multi_reduction <maximumf>, %129, %cst_58 [1] : vector<1x16xf32> to vector<1xf32>
    %131 = vector.shape_cast %130 : vector<1xf32> to vector<1x1xf32>
    %132 = vector.broadcast %131 : vector<1x1xf32> to vector<1x16xf32>
    %133 = arith.subf %129, %132 : vector<1x16xf32>
    %134 = math.exp %133 : vector<1x16xf32>
    %cst_59 = arith.constant dense<0.000000e+00> : vector<1xf32>
    %135 = vector.multi_reduction <add>, %134, %cst_59 [1] : vector<1x16xf32> to vector<1xf32>
    %136 = vector.shape_cast %135 : vector<1xf32> to vector<1x1xf32>
    %137 = vector.broadcast %136 : vector<1x1xf32> to vector<1x16xf32>
    %138 = arith.divf %134, %137 : vector<1x16xf32>
    %c0_60 = arith.constant 0 : index
    %c0_61 = arith.constant 0 : index
    %139 = vector.load %arg2[%c0_60, %c0_61] : memref<16x32xf32, #tpu.memory_space<vmem>>, vector<16x32xf32>
    %cst_62 = arith.constant dense<0.000000e+00> : vector<1x32xf32>
    %140 = tpu.matmul %138, %139, %cst_62 {dimension_numbers = #tpu.dot_dimension_numbers<[1], [0], [0], [1], [0, 0, 1, 1], [], []>} : vector<1x16xf32>, vector<16x32xf32>, vector<1x32xf32> -> vector<1x32xf32>
    %141 = vector.extract_strided_slice %122 {offsets = [0, 32], sizes = [1, 96], strides = [1, 1]} : vector<1x128xf32> to vector<1x96xf32>
    %c0_63 = arith.constant 0 : index
    %c0_64 = arith.constant 0 : index
    %142 = vector.load %arg6[%c0_63, %c0_64] : memref<32x96xf32, #tpu.memory_space<vmem>>, vector<32x96xf32>
    %cst_65 = arith.constant dense<0.000000e+00> : vector<1x96xf32>
    %143 = tpu.matmul %140, %142, %cst_65 {dimension_numbers = #tpu.dot_dimension_numbers<[1], [0], [0], [1], [0, 0, 1, 1], [], []>} : vector<1x32xf32>, vector<32x96xf32>, vector<1x96xf32> -> vector<1x96xf32>
    %144 = arith.addf %141, %143 : vector<1x96xf32>
    %c0_66 = arith.constant 0 : index
    %c0_67 = arith.constant 0 : index
    %145 = vector.load %arg9[%c0_66, %c0_67] : memref<1x96xf32, #tpu.memory_space<vmem>>, vector<1x96xf32>
    %146 = arith.addf %144, %145 : vector<1x96xf32>
    %147 = vector.extract_strided_slice %124 {offsets = [0, 32], sizes = [1, 96], strides = [1, 1]} : vector<1x128xf32> to vector<1x96xf32>
    %c0_68 = arith.constant 0 : index
    %c0_69 = arith.constant 0 : index
    %148 = vector.load %arg10[%c0_68, %c0_69] : memref<1x96xf32, #tpu.memory_space<vmem>>, vector<1x96xf32>
    %149 = arith.addf %147, %148 : vector<1x96xf32>
    %150 = vector.extract_strided_slice %146 {offsets = [0, 0], sizes = [1, 32], strides = [1, 1]} : vector<1x96xf32> to vector<1x32xf32>
    %151 = vector.extract_strided_slice %149 {offsets = [0, 0], sizes = [1, 32], strides = [1, 1]} : vector<1x96xf32> to vector<1x32xf32>
    %152 = arith.addf %150, %151 : vector<1x32xf32>
    %153 = arith.negf %152 : vector<1x32xf32>
    %154 = math.exp %153 : vector<1x32xf32>
    %cst_70 = arith.constant 1.000000e+00 : f32
    %155 = vector.broadcast %cst_70 : f32 to vector<1x32xf32>
    %156 = arith.addf %155, %154 : vector<1x32xf32>
    %157 = arith.divf %155, %156 : vector<1x32xf32>
    %158 = vector.extract_strided_slice %146 {offsets = [0, 32], sizes = [1, 32], strides = [1, 1]} : vector<1x96xf32> to vector<1x32xf32>
    %159 = vector.extract_strided_slice %149 {offsets = [0, 32], sizes = [1, 32], strides = [1, 1]} : vector<1x96xf32> to vector<1x32xf32>
    %160 = arith.addf %158, %159 : vector<1x32xf32>
    %161 = arith.negf %160 : vector<1x32xf32>
    %162 = math.exp %161 : vector<1x32xf32>
    %cst_71 = arith.constant 1.000000e+00 : f32
    %163 = vector.broadcast %cst_71 : f32 to vector<1x32xf32>
    %164 = arith.addf %163, %162 : vector<1x32xf32>
    %165 = arith.divf %163, %164 : vector<1x32xf32>
    %166 = vector.extract_strided_slice %146 {offsets = [0, 64], sizes = [1, 32], strides = [1, 1]} : vector<1x96xf32> to vector<1x32xf32>
    %167 = vector.extract_strided_slice %149 {offsets = [0, 64], sizes = [1, 32], strides = [1, 1]} : vector<1x96xf32> to vector<1x32xf32>
    %168 = arith.mulf %157, %167 : vector<1x32xf32>
    %169 = arith.addf %166, %168 : vector<1x32xf32>
    %170 = math.tanh %169 : vector<1x32xf32>
    %cst_72 = arith.constant 1.000000e+00 : f32
    %171 = vector.broadcast %cst_72 : f32 to vector<1x32xf32>
    %172 = arith.subf %171, %165 : vector<1x32xf32>
    %173 = arith.mulf %172, %170 : vector<1x32xf32>
    %174 = arith.mulf %165, %120 : vector<1x32xf32>
    %175 = arith.addf %173, %174 : vector<1x32xf32>
    %c2 = arith.constant 2 : index
    %c0_73 = arith.constant 0 : index
    %176 = vector.load %arg14[%c2, %c0_73] : memref<8x32xf32, #tpu.memory_space<vmem>>, vector<1x32xf32>
    tpu.vector_store %arg14[%c2, %c0_73], %175 {strides = array<i32>} : memref<8x32xf32, #tpu.memory_space<vmem>>, vector<1x32xf32>,
    %177 = vector.extract_strided_slice %10 {offsets = [3, 0], sizes = [1, 128], strides = [1, 1]} : vector<8x128xf32> to vector<1x128xf32>
    %c0_74 = arith.constant 0 : index
    %c0_75 = arith.constant 0 : index
    %178 = vector.load %arg5[%c0_74, %c0_75] : memref<32x128xf32, #tpu.memory_space<vmem>>, vector<32x128xf32>
    %cst_76 = arith.constant dense<0.000000e+00> : vector<1x128xf32>
    %179 = tpu.matmul %175, %178, %cst_76 {dimension_numbers = #tpu.dot_dimension_numbers<[1], [0], [0], [1], [0, 0, 1, 1], [], []>} : vector<1x32xf32>, vector<32x128xf32>, vector<1x128xf32> -> vector<1x128xf32>
    %180 = vector.extract_strided_slice %177 {offsets = [0, 0], sizes = [1, 16], strides = [1, 1]} : vector<1x128xf32> to vector<1x16xf32>
    %181 = vector.extract_strided_slice %179 {offsets = [0, 0], sizes = [1, 16], strides = [1, 1]} : vector<1x128xf32> to vector<1x16xf32>
    %182 = arith.addf %180, %181 : vector<1x16xf32>
    %c0_77 = arith.constant 0 : index
    %c0_78 = arith.constant 0 : index
    %183 = vector.load %arg8[%c0_77, %c0_78] : memref<1x16xf32, #tpu.memory_space<vmem>>, vector<1x16xf32>
    %184 = arith.addf %182, %183 : vector<1x16xf32>
    %cst_79 = arith.constant dense<0xFF800000> : vector<1xf32>
    %185 = vector.multi_reduction <maximumf>, %184, %cst_79 [1] : vector<1x16xf32> to vector<1xf32>
    %186 = vector.shape_cast %185 : vector<1xf32> to vector<1x1xf32>
    %187 = vector.broadcast %186 : vector<1x1xf32> to vector<1x16xf32>
    %188 = arith.subf %184, %187 : vector<1x16xf32>
    %189 = math.exp %188 : vector<1x16xf32>
    %cst_80 = arith.constant dense<0.000000e+00> : vector<1xf32>
    %190 = vector.multi_reduction <add>, %189, %cst_80 [1] : vector<1x16xf32> to vector<1xf32>
    %191 = vector.shape_cast %190 : vector<1xf32> to vector<1x1xf32>
    %192 = vector.broadcast %191 : vector<1x1xf32> to vector<1x16xf32>
    %193 = arith.divf %189, %192 : vector<1x16xf32>
    %c0_81 = arith.constant 0 : index
    %c0_82 = arith.constant 0 : index
    %194 = vector.load %arg2[%c0_81, %c0_82] : memref<16x32xf32, #tpu.memory_space<vmem>>, vector<16x32xf32>
    %cst_83 = arith.constant dense<0.000000e+00> : vector<1x32xf32>
    %195 = tpu.matmul %193, %194, %cst_83 {dimension_numbers = #tpu.dot_dimension_numbers<[1], [0], [0], [1], [0, 0, 1, 1], [], []>} : vector<1x16xf32>, vector<16x32xf32>, vector<1x32xf32> -> vector<1x32xf32>
    %196 = vector.extract_strided_slice %177 {offsets = [0, 32], sizes = [1, 96], strides = [1, 1]} : vector<1x128xf32> to vector<1x96xf32>
    %c0_84 = arith.constant 0 : index
    %c0_85 = arith.constant 0 : index
    %197 = vector.load %arg6[%c0_84, %c0_85] : memref<32x96xf32, #tpu.memory_space<vmem>>, vector<32x96xf32>
    %cst_86 = arith.constant dense<0.000000e+00> : vector<1x96xf32>
    %198 = tpu.matmul %195, %197, %cst_86 {dimension_numbers = #tpu.dot_dimension_numbers<[1], [0], [0], [1], [0, 0, 1, 1], [], []>} : vector<1x32xf32>, vector<32x96xf32>, vector<1x96xf32> -> vector<1x96xf32>
    %199 = arith.addf %196, %198 : vector<1x96xf32>
    %c0_87 = arith.constant 0 : index
    %c0_88 = arith.constant 0 : index
    %200 = vector.load %arg9[%c0_87, %c0_88] : memref<1x96xf32, #tpu.memory_space<vmem>>, vector<1x96xf32>
    %201 = arith.addf %199, %200 : vector<1x96xf32>
    %202 = vector.extract_strided_slice %179 {offsets = [0, 32], sizes = [1, 96], strides = [1, 1]} : vector<1x128xf32> to vector<1x96xf32>
    %c0_89 = arith.constant 0 : index
    %c0_90 = arith.constant 0 : index
    %203 = vector.load %arg10[%c0_89, %c0_90] : memref<1x96xf32, #tpu.memory_space<vmem>>, vector<1x96xf32>
    %204 = arith.addf %202, %203 : vector<1x96xf32>
    %205 = vector.extract_strided_slice %201 {offsets = [0, 0], sizes = [1, 32], strides = [1, 1]} : vector<1x96xf32> to vector<1x32xf32>
    %206 = vector.extract_strided_slice %204 {offsets = [0, 0], sizes = [1, 32], strides = [1, 1]} : vector<1x96xf32> to vector<1x32xf32>
    %207 = arith.addf %205, %206 : vector<1x32xf32>
    %208 = arith.negf %207 : vector<1x32xf32>
    %209 = math.exp %208 : vector<1x32xf32>
    %cst_91 = arith.constant 1.000000e+00 : f32
    %210 = vector.broadcast %cst_91 : f32 to vector<1x32xf32>
    %211 = arith.addf %210, %209 : vector<1x32xf32>
    %212 = arith.divf %210, %211 : vector<1x32xf32>
    %213 = vector.extract_strided_slice %201 {offsets = [0, 32], sizes = [1, 32], strides = [1, 1]} : vector<1x96xf32> to vector<1x32xf32>
    %214 = vector.extract_strided_slice %204 {offsets = [0, 32], sizes = [1, 32], strides = [1, 1]} : vector<1x96xf32> to vector<1x32xf32>
    %215 = arith.addf %213, %214 : vector<1x32xf32>
    %216 = arith.negf %215 : vector<1x32xf32>
    %217 = math.exp %216 : vector<1x32xf32>
    %cst_92 = arith.constant 1.000000e+00 : f32
    %218 = vector.broadcast %cst_92 : f32 to vector<1x32xf32>
    %219 = arith.addf %218, %217 : vector<1x32xf32>
    %220 = arith.divf %218, %219 : vector<1x32xf32>
    %221 = vector.extract_strided_slice %201 {offsets = [0, 64], sizes = [1, 32], strides = [1, 1]} : vector<1x96xf32> to vector<1x32xf32>
    %222 = vector.extract_strided_slice %204 {offsets = [0, 64], sizes = [1, 32], strides = [1, 1]} : vector<1x96xf32> to vector<1x32xf32>
    %223 = arith.mulf %212, %222 : vector<1x32xf32>
    %224 = arith.addf %221, %223 : vector<1x32xf32>
    %225 = math.tanh %224 : vector<1x32xf32>
    %cst_93 = arith.constant 1.000000e+00 : f32
    %226 = vector.broadcast %cst_93 : f32 to vector<1x32xf32>
    %227 = arith.subf %226, %220 : vector<1x32xf32>
    %228 = arith.mulf %227, %225 : vector<1x32xf32>
    %229 = arith.mulf %220, %175 : vector<1x32xf32>
    %230 = arith.addf %228, %229 : vector<1x32xf32>
    %c3 = arith.constant 3 : index
    %c0_94 = arith.constant 0 : index
    %231 = vector.load %arg14[%c3, %c0_94] : memref<8x32xf32, #tpu.memory_space<vmem>>, vector<1x32xf32>
    tpu.vector_store %arg14[%c3, %c0_94], %230 {strides = array<i32>} : memref<8x32xf32, #tpu.memory_space<vmem>>, vector<1x32xf32>,
    %232 = vector.extract_strided_slice %10 {offsets = [4, 0], sizes = [1, 128], strides = [1, 1]} : vector<8x128xf32> to vector<1x128xf32>
    %c0_95 = arith.constant 0 : index
    %c0_96 = arith.constant 0 : index
    %233 = vector.load %arg5[%c0_95, %c0_96] : memref<32x128xf32, #tpu.memory_space<vmem>>, vector<32x128xf32>
    %cst_97 = arith.constant dense<0.000000e+00> : vector<1x128xf32>
    %234 = tpu.matmul %230, %233, %cst_97 {dimension_numbers = #tpu.dot_dimension_numbers<[1], [0], [0], [1], [0, 0, 1, 1], [], []>} : vector<1x32xf32>, vector<32x128xf32>, vector<1x128xf32> -> vector<1x128xf32>
    %235 = vector.extract_strided_slice %232 {offsets = [0, 0], sizes = [1, 16], strides = [1, 1]} : vector<1x128xf32> to vector<1x16xf32>
    %236 = vector.extract_strided_slice %234 {offsets = [0, 0], sizes = [1, 16], strides = [1, 1]} : vector<1x128xf32> to vector<1x16xf32>
    %237 = arith.addf %235, %236 : vector<1x16xf32>
    %c0_98 = arith.constant 0 : index
    %c0_99 = arith.constant 0 : index
    %238 = vector.load %arg8[%c0_98, %c0_99] : memref<1x16xf32, #tpu.memory_space<vmem>>, vector<1x16xf32>
    %239 = arith.addf %237, %238 : vector<1x16xf32>
    %cst_100 = arith.constant dense<0xFF800000> : vector<1xf32>
    %240 = vector.multi_reduction <maximumf>, %239, %cst_100 [1] : vector<1x16xf32> to vector<1xf32>
    %241 = vector.shape_cast %240 : vector<1xf32> to vector<1x1xf32>
    %242 = vector.broadcast %241 : vector<1x1xf32> to vector<1x16xf32>
    %243 = arith.subf %239, %242 : vector<1x16xf32>
    %244 = math.exp %243 : vector<1x16xf32>
    %cst_101 = arith.constant dense<0.000000e+00> : vector<1xf32>
    %245 = vector.multi_reduction <add>, %244, %cst_101 [1] : vector<1x16xf32> to vector<1xf32>
    %246 = vector.shape_cast %245 : vector<1xf32> to vector<1x1xf32>
    %247 = vector.broadcast %246 : vector<1x1xf32> to vector<1x16xf32>
    %248 = arith.divf %244, %247 : vector<1x16xf32>
    %c0_102 = arith.constant 0 : index
    %c0_103 = arith.constant 0 : index
    %249 = vector.load %arg2[%c0_102, %c0_103] : memref<16x32xf32, #tpu.memory_space<vmem>>, vector<16x32xf32>
    %cst_104 = arith.constant dense<0.000000e+00> : vector<1x32xf32>
    %250 = tpu.matmul %248, %249, %cst_104 {dimension_numbers = #tpu.dot_dimension_numbers<[1], [0], [0], [1], [0, 0, 1, 1], [], []>} : vector<1x16xf32>, vector<16x32xf32>, vector<1x32xf32> -> vector<1x32xf32>
    %251 = vector.extract_strided_slice %232 {offsets = [0, 32], sizes = [1, 96], strides = [1, 1]} : vector<1x128xf32> to vector<1x96xf32>
    %c0_105 = arith.constant 0 : index
    %c0_106 = arith.constant 0 : index
    %252 = vector.load %arg6[%c0_105, %c0_106] : memref<32x96xf32, #tpu.memory_space<vmem>>, vector<32x96xf32>
    %cst_107 = arith.constant dense<0.000000e+00> : vector<1x96xf32>
    %253 = tpu.matmul %250, %252, %cst_107 {dimension_numbers = #tpu.dot_dimension_numbers<[1], [0], [0], [1], [0, 0, 1, 1], [], []>} : vector<1x32xf32>, vector<32x96xf32>, vector<1x96xf32> -> vector<1x96xf32>
    %254 = arith.addf %251, %253 : vector<1x96xf32>
    %c0_108 = arith.constant 0 : index
    %c0_109 = arith.constant 0 : index
    %255 = vector.load %arg9[%c0_108, %c0_109] : memref<1x96xf32, #tpu.memory_space<vmem>>, vector<1x96xf32>
    %256 = arith.addf %254, %255 : vector<1x96xf32>
    %257 = vector.extract_strided_slice %234 {offsets = [0, 32], sizes = [1, 96], strides = [1, 1]} : vector<1x128xf32> to vector<1x96xf32>
    %c0_110 = arith.constant 0 : index
    %c0_111 = arith.constant 0 : index
    %258 = vector.load %arg10[%c0_110, %c0_111] : memref<1x96xf32, #tpu.memory_space<vmem>>, vector<1x96xf32>
    %259 = arith.addf %257, %258 : vector<1x96xf32>
    %260 = vector.extract_strided_slice %256 {offsets = [0, 0], sizes = [1, 32], strides = [1, 1]} : vector<1x96xf32> to vector<1x32xf32>
    %261 = vector.extract_strided_slice %259 {offsets = [0, 0], sizes = [1, 32], strides = [1, 1]} : vector<1x96xf32> to vector<1x32xf32>
    %262 = arith.addf %260, %261 : vector<1x32xf32>
    %263 = arith.negf %262 : vector<1x32xf32>
    %264 = math.exp %263 : vector<1x32xf32>
    %cst_112 = arith.constant 1.000000e+00 : f32
    %265 = vector.broadcast %cst_112 : f32 to vector<1x32xf32>
    %266 = arith.addf %265, %264 : vector<1x32xf32>
    %267 = arith.divf %265, %266 : vector<1x32xf32>
    %268 = vector.extract_strided_slice %256 {offsets = [0, 32], sizes = [1, 32], strides = [1, 1]} : vector<1x96xf32> to vector<1x32xf32>
    %269 = vector.extract_strided_slice %259 {offsets = [0, 32], sizes = [1, 32], strides = [1, 1]} : vector<1x96xf32> to vector<1x32xf32>
    %270 = arith.addf %268, %269 : vector<1x32xf32>
    %271 = arith.negf %270 : vector<1x32xf32>
    %272 = math.exp %271 : vector<1x32xf32>
    %cst_113 = arith.constant 1.000000e+00 : f32
    %273 = vector.broadcast %cst_113 : f32 to vector<1x32xf32>
    %274 = arith.addf %273, %272 : vector<1x32xf32>
    %275 = arith.divf %273, %274 : vector<1x32xf32>
    %276 = vector.extract_strided_slice %256 {offsets = [0, 64], sizes = [1, 32], strides = [1, 1]} : vector<1x96xf32> to vector<1x32xf32>
    %277 = vector.extract_strided_slice %259 {offsets = [0, 64], sizes = [1, 32], strides = [1, 1]} : vector<1x96xf32> to vector<1x32xf32>
    %278 = arith.mulf %267, %277 : vector<1x32xf32>
    %279 = arith.addf %276, %278 : vector<1x32xf32>
    %280 = math.tanh %279 : vector<1x32xf32>
    %cst_114 = arith.constant 1.000000e+00 : f32
    %281 = vector.broadcast %cst_114 : f32 to vector<1x32xf32>
    %282 = arith.subf %281, %275 : vector<1x32xf32>
    %283 = arith.mulf %282, %280 : vector<1x32xf32>
    %284 = arith.mulf %275, %230 : vector<1x32xf32>
    %285 = arith.addf %283, %284 : vector<1x32xf32>
    %c4 = arith.constant 4 : index
    %c0_115 = arith.constant 0 : index
    %286 = vector.load %arg14[%c4, %c0_115] : memref<8x32xf32, #tpu.memory_space<vmem>>, vector<1x32xf32>
    tpu.vector_store %arg14[%c4, %c0_115], %285 {strides = array<i32>} : memref<8x32xf32, #tpu.memory_space<vmem>>, vector<1x32xf32>,
    %287 = vector.extract_strided_slice %10 {offsets = [5, 0], sizes = [1, 128], strides = [1, 1]} : vector<8x128xf32> to vector<1x128xf32>
    %c0_116 = arith.constant 0 : index
    %c0_117 = arith.constant 0 : index
    %288 = vector.load %arg5[%c0_116, %c0_117] : memref<32x128xf32, #tpu.memory_space<vmem>>, vector<32x128xf32>
    %cst_118 = arith.constant dense<0.000000e+00> : vector<1x128xf32>
    %289 = tpu.matmul %285, %288, %cst_118 {dimension_numbers = #tpu.dot_dimension_numbers<[1], [0], [0], [1], [0, 0, 1, 1], [], []>} : vector<1x32xf32>, vector<32x128xf32>, vector<1x128xf32> -> vector<1x128xf32>
    %290 = vector.extract_strided_slice %287 {offsets = [0, 0], sizes = [1, 16], strides = [1, 1]} : vector<1x128xf32> to vector<1x16xf32>
    %291 = vector.extract_strided_slice %289 {offsets = [0, 0], sizes = [1, 16], strides = [1, 1]} : vector<1x128xf32> to vector<1x16xf32>
    %292 = arith.addf %290, %291 : vector<1x16xf32>
    %c0_119 = arith.constant 0 : index
    %c0_120 = arith.constant 0 : index
    %293 = vector.load %arg8[%c0_119, %c0_120] : memref<1x16xf32, #tpu.memory_space<vmem>>, vector<1x16xf32>
    %294 = arith.addf %292, %293 : vector<1x16xf32>
    %cst_121 = arith.constant dense<0xFF800000> : vector<1xf32>
    %295 = vector.multi_reduction <maximumf>, %294, %cst_121 [1] : vector<1x16xf32> to vector<1xf32>
    %296 = vector.shape_cast %295 : vector<1xf32> to vector<1x1xf32>
    %297 = vector.broadcast %296 : vector<1x1xf32> to vector<1x16xf32>
    %298 = arith.subf %294, %297 : vector<1x16xf32>
    %299 = math.exp %298 : vector<1x16xf32>
    %cst_122 = arith.constant dense<0.000000e+00> : vector<1xf32>
    %300 = vector.multi_reduction <add>, %299, %cst_122 [1] : vector<1x16xf32> to vector<1xf32>
    %301 = vector.shape_cast %300 : vector<1xf32> to vector<1x1xf32>
    %302 = vector.broadcast %301 : vector<1x1xf32> to vector<1x16xf32>
    %303 = arith.divf %299, %302 : vector<1x16xf32>
    %c0_123 = arith.constant 0 : index
    %c0_124 = arith.constant 0 : index
    %304 = vector.load %arg2[%c0_123, %c0_124] : memref<16x32xf32, #tpu.memory_space<vmem>>, vector<16x32xf32>
    %cst_125 = arith.constant dense<0.000000e+00> : vector<1x32xf32>
    %305 = tpu.matmul %303, %304, %cst_125 {dimension_numbers = #tpu.dot_dimension_numbers<[1], [0], [0], [1], [0, 0, 1, 1], [], []>} : vector<1x16xf32>, vector<16x32xf32>, vector<1x32xf32> -> vector<1x32xf32>
    %306 = vector.extract_strided_slice %287 {offsets = [0, 32], sizes = [1, 96], strides = [1, 1]} : vector<1x128xf32> to vector<1x96xf32>
    %c0_126 = arith.constant 0 : index
    %c0_127 = arith.constant 0 : index
    %307 = vector.load %arg6[%c0_126, %c0_127] : memref<32x96xf32, #tpu.memory_space<vmem>>, vector<32x96xf32>
    %cst_128 = arith.constant dense<0.000000e+00> : vector<1x96xf32>
    %308 = tpu.matmul %305, %307, %cst_128 {dimension_numbers = #tpu.dot_dimension_numbers<[1], [0], [0], [1], [0, 0, 1, 1], [], []>} : vector<1x32xf32>, vector<32x96xf32>, vector<1x96xf32> -> vector<1x96xf32>
    %309 = arith.addf %306, %308 : vector<1x96xf32>
    %c0_129 = arith.constant 0 : index
    %c0_130 = arith.constant 0 : index
    %310 = vector.load %arg9[%c0_129, %c0_130] : memref<1x96xf32, #tpu.memory_space<vmem>>, vector<1x96xf32>
    %311 = arith.addf %309, %310 : vector<1x96xf32>
    %312 = vector.extract_strided_slice %289 {offsets = [0, 32], sizes = [1, 96], strides = [1, 1]} : vector<1x128xf32> to vector<1x96xf32>
    %c0_131 = arith.constant 0 : index
    %c0_132 = arith.constant 0 : index
    %313 = vector.load %arg10[%c0_131, %c0_132] : memref<1x96xf32, #tpu.memory_space<vmem>>, vector<1x96xf32>
    %314 = arith.addf %312, %313 : vector<1x96xf32>
    %315 = vector.extract_strided_slice %311 {offsets = [0, 0], sizes = [1, 32], strides = [1, 1]} : vector<1x96xf32> to vector<1x32xf32>
    %316 = vector.extract_strided_slice %314 {offsets = [0, 0], sizes = [1, 32], strides = [1, 1]} : vector<1x96xf32> to vector<1x32xf32>
    %317 = arith.addf %315, %316 : vector<1x32xf32>
    %318 = arith.negf %317 : vector<1x32xf32>
    %319 = math.exp %318 : vector<1x32xf32>
    %cst_133 = arith.constant 1.000000e+00 : f32
    %320 = vector.broadcast %cst_133 : f32 to vector<1x32xf32>
    %321 = arith.addf %320, %319 : vector<1x32xf32>
    %322 = arith.divf %320, %321 : vector<1x32xf32>
    %323 = vector.extract_strided_slice %311 {offsets = [0, 32], sizes = [1, 32], strides = [1, 1]} : vector<1x96xf32> to vector<1x32xf32>
    %324 = vector.extract_strided_slice %314 {offsets = [0, 32], sizes = [1, 32], strides = [1, 1]} : vector<1x96xf32> to vector<1x32xf32>
    %325 = arith.addf %323, %324 : vector<1x32xf32>
    %326 = arith.negf %325 : vector<1x32xf32>
    %327 = math.exp %326 : vector<1x32xf32>
    %cst_134 = arith.constant 1.000000e+00 : f32
    %328 = vector.broadcast %cst_134 : f32 to vector<1x32xf32>
    %329 = arith.addf %328, %327 : vector<1x32xf32>
    %330 = arith.divf %328, %329 : vector<1x32xf32>
    %331 = vector.extract_strided_slice %311 {offsets = [0, 64], sizes = [1, 32], strides = [1, 1]} : vector<1x96xf32> to vector<1x32xf32>
    %332 = vector.extract_strided_slice %314 {offsets = [0, 64], sizes = [1, 32], strides = [1, 1]} : vector<1x96xf32> to vector<1x32xf32>
    %333 = arith.mulf %322, %332 : vector<1x32xf32>
    %334 = arith.addf %331, %333 : vector<1x32xf32>
    %335 = math.tanh %334 : vector<1x32xf32>
    %cst_135 = arith.constant 1.000000e+00 : f32
    %336 = vector.broadcast %cst_135 : f32 to vector<1x32xf32>
    %337 = arith.subf %336, %330 : vector<1x32xf32>
    %338 = arith.mulf %337, %335 : vector<1x32xf32>
    %339 = arith.mulf %330, %285 : vector<1x32xf32>
    %340 = arith.addf %338, %339 : vector<1x32xf32>
    %c5 = arith.constant 5 : index
    %c0_136 = arith.constant 0 : index
    %341 = vector.load %arg14[%c5, %c0_136] : memref<8x32xf32, #tpu.memory_space<vmem>>, vector<1x32xf32>
    tpu.vector_store %arg14[%c5, %c0_136], %340 {strides = array<i32>} : memref<8x32xf32, #tpu.memory_space<vmem>>, vector<1x32xf32>,
    %342 = vector.extract_strided_slice %10 {offsets = [6, 0], sizes = [1, 128], strides = [1, 1]} : vector<8x128xf32> to vector<1x128xf32>
    %c0_137 = arith.constant 0 : index
    %c0_138 = arith.constant 0 : index
    %343 = vector.load %arg5[%c0_137, %c0_138] : memref<32x128xf32, #tpu.memory_space<vmem>>, vector<32x128xf32>
    %cst_139 = arith.constant dense<0.000000e+00> : vector<1x128xf32>
    %344 = tpu.matmul %340, %343, %cst_139 {dimension_numbers = #tpu.dot_dimension_numbers<[1], [0], [0], [1], [0, 0, 1, 1], [], []>} : vector<1x32xf32>, vector<32x128xf32>, vector<1x128xf32> -> vector<1x128xf32>
    %345 = vector.extract_strided_slice %342 {offsets = [0, 0], sizes = [1, 16], strides = [1, 1]} : vector<1x128xf32> to vector<1x16xf32>
    %346 = vector.extract_strided_slice %344 {offsets = [0, 0], sizes = [1, 16], strides = [1, 1]} : vector<1x128xf32> to vector<1x16xf32>
    %347 = arith.addf %345, %346 : vector<1x16xf32>
    %c0_140 = arith.constant 0 : index
    %c0_141 = arith.constant 0 : index
    %348 = vector.load %arg8[%c0_140, %c0_141] : memref<1x16xf32, #tpu.memory_space<vmem>>, vector<1x16xf32>
    %349 = arith.addf %347, %348 : vector<1x16xf32>
    %cst_142 = arith.constant dense<0xFF800000> : vector<1xf32>
    %350 = vector.multi_reduction <maximumf>, %349, %cst_142 [1] : vector<1x16xf32> to vector<1xf32>
    %351 = vector.shape_cast %350 : vector<1xf32> to vector<1x1xf32>
    %352 = vector.broadcast %351 : vector<1x1xf32> to vector<1x16xf32>
    %353 = arith.subf %349, %352 : vector<1x16xf32>
    %354 = math.exp %353 : vector<1x16xf32>
    %cst_143 = arith.constant dense<0.000000e+00> : vector<1xf32>
    %355 = vector.multi_reduction <add>, %354, %cst_143 [1] : vector<1x16xf32> to vector<1xf32>
    %356 = vector.shape_cast %355 : vector<1xf32> to vector<1x1xf32>
    %357 = vector.broadcast %356 : vector<1x1xf32> to vector<1x16xf32>
    %358 = arith.divf %354, %357 : vector<1x16xf32>
    %c0_144 = arith.constant 0 : index
    %c0_145 = arith.constant 0 : index
    %359 = vector.load %arg2[%c0_144, %c0_145] : memref<16x32xf32, #tpu.memory_space<vmem>>, vector<16x32xf32>
    %cst_146 = arith.constant dense<0.000000e+00> : vector<1x32xf32>
    %360 = tpu.matmul %358, %359, %cst_146 {dimension_numbers = #tpu.dot_dimension_numbers<[1], [0], [0], [1], [0, 0, 1, 1], [], []>} : vector<1x16xf32>, vector<16x32xf32>, vector<1x32xf32> -> vector<1x32xf32>
    %361 = vector.extract_strided_slice %342 {offsets = [0, 32], sizes = [1, 96], strides = [1, 1]} : vector<1x128xf32> to vector<1x96xf32>
    %c0_147 = arith.constant 0 : index
    %c0_148 = arith.constant 0 : index
    %362 = vector.load %arg6[%c0_147, %c0_148] : memref<32x96xf32, #tpu.memory_space<vmem>>, vector<32x96xf32>
    %cst_149 = arith.constant dense<0.000000e+00> : vector<1x96xf32>
    %363 = tpu.matmul %360, %362, %cst_149 {dimension_numbers = #tpu.dot_dimension_numbers<[1], [0], [0], [1], [0, 0, 1, 1], [], []>} : vector<1x32xf32>, vector<32x96xf32>, vector<1x96xf32> -> vector<1x96xf32>
    %364 = arith.addf %361, %363 : vector<1x96xf32>
    %c0_150 = arith.constant 0 : index
    %c0_151 = arith.constant 0 : index
    %365 = vector.load %arg9[%c0_150, %c0_151] : memref<1x96xf32, #tpu.memory_space<vmem>>, vector<1x96xf32>
    %366 = arith.addf %364, %365 : vector<1x96xf32>
    %367 = vector.extract_strided_slice %344 {offsets = [0, 32], sizes = [1, 96], strides = [1, 1]} : vector<1x128xf32> to vector<1x96xf32>
    %c0_152 = arith.constant 0 : index
    %c0_153 = arith.constant 0 : index
    %368 = vector.load %arg10[%c0_152, %c0_153] : memref<1x96xf32, #tpu.memory_space<vmem>>, vector<1x96xf32>
    %369 = arith.addf %367, %368 : vector<1x96xf32>
    %370 = vector.extract_strided_slice %366 {offsets = [0, 0], sizes = [1, 32], strides = [1, 1]} : vector<1x96xf32> to vector<1x32xf32>
    %371 = vector.extract_strided_slice %369 {offsets = [0, 0], sizes = [1, 32], strides = [1, 1]} : vector<1x96xf32> to vector<1x32xf32>
    %372 = arith.addf %370, %371 : vector<1x32xf32>
    %373 = arith.negf %372 : vector<1x32xf32>
    %374 = math.exp %373 : vector<1x32xf32>
    %cst_154 = arith.constant 1.000000e+00 : f32
    %375 = vector.broadcast %cst_154 : f32 to vector<1x32xf32>
    %376 = arith.addf %375, %374 : vector<1x32xf32>
    %377 = arith.divf %375, %376 : vector<1x32xf32>
    %378 = vector.extract_strided_slice %366 {offsets = [0, 32], sizes = [1, 32], strides = [1, 1]} : vector<1x96xf32> to vector<1x32xf32>
    %379 = vector.extract_strided_slice %369 {offsets = [0, 32], sizes = [1, 32], strides = [1, 1]} : vector<1x96xf32> to vector<1x32xf32>
    %380 = arith.addf %378, %379 : vector<1x32xf32>
    %381 = arith.negf %380 : vector<1x32xf32>
    %382 = math.exp %381 : vector<1x32xf32>
    %cst_155 = arith.constant 1.000000e+00 : f32
    %383 = vector.broadcast %cst_155 : f32 to vector<1x32xf32>
    %384 = arith.addf %383, %382 : vector<1x32xf32>
    %385 = arith.divf %383, %384 : vector<1x32xf32>
    %386 = vector.extract_strided_slice %366 {offsets = [0, 64], sizes = [1, 32], strides = [1, 1]} : vector<1x96xf32> to vector<1x32xf32>
    %387 = vector.extract_strided_slice %369 {offsets = [0, 64], sizes = [1, 32], strides = [1, 1]} : vector<1x96xf32> to vector<1x32xf32>
    %388 = arith.mulf %377, %387 : vector<1x32xf32>
    %389 = arith.addf %386, %388 : vector<1x32xf32>
    %390 = math.tanh %389 : vector<1x32xf32>
    %cst_156 = arith.constant 1.000000e+00 : f32
    %391 = vector.broadcast %cst_156 : f32 to vector<1x32xf32>
    %392 = arith.subf %391, %385 : vector<1x32xf32>
    %393 = arith.mulf %392, %390 : vector<1x32xf32>
    %394 = arith.mulf %385, %340 : vector<1x32xf32>
    %395 = arith.addf %393, %394 : vector<1x32xf32>
    %c6 = arith.constant 6 : index
    %c0_157 = arith.constant 0 : index
    %396 = vector.load %arg14[%c6, %c0_157] : memref<8x32xf32, #tpu.memory_space<vmem>>, vector<1x32xf32>
    tpu.vector_store %arg14[%c6, %c0_157], %395 {strides = array<i32>} : memref<8x32xf32, #tpu.memory_space<vmem>>, vector<1x32xf32>,
    %397 = vector.extract_strided_slice %10 {offsets = [7, 0], sizes = [1, 128], strides = [1, 1]} : vector<8x128xf32> to vector<1x128xf32>
    %c0_158 = arith.constant 0 : index
    %c0_159 = arith.constant 0 : index
    %398 = vector.load %arg5[%c0_158, %c0_159] : memref<32x128xf32, #tpu.memory_space<vmem>>, vector<32x128xf32>
    %cst_160 = arith.constant dense<0.000000e+00> : vector<1x128xf32>
    %399 = tpu.matmul %395, %398, %cst_160 {dimension_numbers = #tpu.dot_dimension_numbers<[1], [0], [0], [1], [0, 0, 1, 1], [], []>} : vector<1x32xf32>, vector<32x128xf32>, vector<1x128xf32> -> vector<1x128xf32>
    %400 = vector.extract_strided_slice %397 {offsets = [0, 0], sizes = [1, 16], strides = [1, 1]} : vector<1x128xf32> to vector<1x16xf32>
    %401 = vector.extract_strided_slice %399 {offsets = [0, 0], sizes = [1, 16], strides = [1, 1]} : vector<1x128xf32> to vector<1x16xf32>
    %402 = arith.addf %400, %401 : vector<1x16xf32>
    %c0_161 = arith.constant 0 : index
    %c0_162 = arith.constant 0 : index
    %403 = vector.load %arg8[%c0_161, %c0_162] : memref<1x16xf32, #tpu.memory_space<vmem>>, vector<1x16xf32>
    %404 = arith.addf %402, %403 : vector<1x16xf32>
    %cst_163 = arith.constant dense<0xFF800000> : vector<1xf32>
    %405 = vector.multi_reduction <maximumf>, %404, %cst_163 [1] : vector<1x16xf32> to vector<1xf32>
    %406 = vector.shape_cast %405 : vector<1xf32> to vector<1x1xf32>
    %407 = vector.broadcast %406 : vector<1x1xf32> to vector<1x16xf32>
    %408 = arith.subf %404, %407 : vector<1x16xf32>
    %409 = math.exp %408 : vector<1x16xf32>
    %cst_164 = arith.constant dense<0.000000e+00> : vector<1xf32>
    %410 = vector.multi_reduction <add>, %409, %cst_164 [1] : vector<1x16xf32> to vector<1xf32>
    %411 = vector.shape_cast %410 : vector<1xf32> to vector<1x1xf32>
    %412 = vector.broadcast %411 : vector<1x1xf32> to vector<1x16xf32>
    %413 = arith.divf %409, %412 : vector<1x16xf32>
    %c0_165 = arith.constant 0 : index
    %c0_166 = arith.constant 0 : index
    %414 = vector.load %arg2[%c0_165, %c0_166] : memref<16x32xf32, #tpu.memory_space<vmem>>, vector<16x32xf32>
    %cst_167 = arith.constant dense<0.000000e+00> : vector<1x32xf32>
    %415 = tpu.matmul %413, %414, %cst_167 {dimension_numbers = #tpu.dot_dimension_numbers<[1], [0], [0], [1], [0, 0, 1, 1], [], []>} : vector<1x16xf32>, vector<16x32xf32>, vector<1x32xf32> -> vector<1x32xf32>
    %416 = vector.extract_strided_slice %397 {offsets = [0, 32], sizes = [1, 96], strides = [1, 1]} : vector<1x128xf32> to vector<1x96xf32>
    %c0_168 = arith.constant 0 : index
    %c0_169 = arith.constant 0 : index
    %417 = vector.load %arg6[%c0_168, %c0_169] : memref<32x96xf32, #tpu.memory_space<vmem>>, vector<32x96xf32>
    %cst_170 = arith.constant dense<0.000000e+00> : vector<1x96xf32>
    %418 = tpu.matmul %415, %417, %cst_170 {dimension_numbers = #tpu.dot_dimension_numbers<[1], [0], [0], [1], [0, 0, 1, 1], [], []>} : vector<1x32xf32>, vector<32x96xf32>, vector<1x96xf32> -> vector<1x96xf32>
    %419 = arith.addf %416, %418 : vector<1x96xf32>
    %c0_171 = arith.constant 0 : index
    %c0_172 = arith.constant 0 : index
    %420 = vector.load %arg9[%c0_171, %c0_172] : memref<1x96xf32, #tpu.memory_space<vmem>>, vector<1x96xf32>
    %421 = arith.addf %419, %420 : vector<1x96xf32>
    %422 = vector.extract_strided_slice %399 {offsets = [0, 32], sizes = [1, 96], strides = [1, 1]} : vector<1x128xf32> to vector<1x96xf32>
    %c0_173 = arith.constant 0 : index
    %c0_174 = arith.constant 0 : index
    %423 = vector.load %arg10[%c0_173, %c0_174] : memref<1x96xf32, #tpu.memory_space<vmem>>, vector<1x96xf32>
    %424 = arith.addf %422, %423 : vector<1x96xf32>
    %425 = vector.extract_strided_slice %421 {offsets = [0, 0], sizes = [1, 32], strides = [1, 1]} : vector<1x96xf32> to vector<1x32xf32>
    %426 = vector.extract_strided_slice %424 {offsets = [0, 0], sizes = [1, 32], strides = [1, 1]} : vector<1x96xf32> to vector<1x32xf32>
    %427 = arith.addf %425, %426 : vector<1x32xf32>
    %428 = arith.negf %427 : vector<1x32xf32>
    %429 = math.exp %428 : vector<1x32xf32>
    %cst_175 = arith.constant 1.000000e+00 : f32
    %430 = vector.broadcast %cst_175 : f32 to vector<1x32xf32>
    %431 = arith.addf %430, %429 : vector<1x32xf32>
    %432 = arith.divf %430, %431 : vector<1x32xf32>
    %433 = vector.extract_strided_slice %421 {offsets = [0, 32], sizes = [1, 32], strides = [1, 1]} : vector<1x96xf32> to vector<1x32xf32>
    %434 = vector.extract_strided_slice %424 {offsets = [0, 32], sizes = [1, 32], strides = [1, 1]} : vector<1x96xf32> to vector<1x32xf32>
    %435 = arith.addf %433, %434 : vector<1x32xf32>
    %436 = arith.negf %435 : vector<1x32xf32>
    %437 = math.exp %436 : vector<1x32xf32>
    %cst_176 = arith.constant 1.000000e+00 : f32
    %438 = vector.broadcast %cst_176 : f32 to vector<1x32xf32>
    %439 = arith.addf %438, %437 : vector<1x32xf32>
    %440 = arith.divf %438, %439 : vector<1x32xf32>
    %441 = vector.extract_strided_slice %421 {offsets = [0, 64], sizes = [1, 32], strides = [1, 1]} : vector<1x96xf32> to vector<1x32xf32>
    %442 = vector.extract_strided_slice %424 {offsets = [0, 64], sizes = [1, 32], strides = [1, 1]} : vector<1x96xf32> to vector<1x32xf32>
    %443 = arith.mulf %432, %442 : vector<1x32xf32>
    %444 = arith.addf %441, %443 : vector<1x32xf32>
    %445 = math.tanh %444 : vector<1x32xf32>
    %cst_177 = arith.constant 1.000000e+00 : f32
    %446 = vector.broadcast %cst_177 : f32 to vector<1x32xf32>
    %447 = arith.subf %446, %440 : vector<1x32xf32>
    %448 = arith.mulf %447, %445 : vector<1x32xf32>
    %449 = arith.mulf %440, %395 : vector<1x32xf32>
    %450 = arith.addf %448, %449 : vector<1x32xf32>
    %c7 = arith.constant 7 : index
    %c0_178 = arith.constant 0 : index
    %451 = vector.load %arg14[%c7, %c0_178] : memref<8x32xf32, #tpu.memory_space<vmem>>, vector<1x32xf32>
    tpu.vector_store %arg14[%c7, %c0_178], %450 {strides = array<i32>} : memref<8x32xf32, #tpu.memory_space<vmem>>, vector<1x32xf32>,
    %c0_179 = arith.constant 0 : index
    %c0_180 = arith.constant 0 : index
    %452 = vector.load %arg13[%c0_179, %c0_180] : memref<1x32xf32, #tpu.memory_space<vmem>>, vector<1x32xf32>
    tpu.vector_store %arg13[%c0_179, %c0_180], %450 {strides = array<i32>} : memref<1x32xf32, #tpu.memory_space<vmem>>, vector<1x32xf32>,
    %c0_181 = arith.constant 0 : index
    %c0_182 = arith.constant 0 : index
    %453 = vector.load %arg14[%c0_181, %c0_182] : memref<8x32xf32, #tpu.memory_space<vmem>>, vector<8x32xf32>
    %c0_183 = arith.constant 0 : index
    %c0_184 = arith.constant 0 : index
    %454 = vector.load %arg7[%c0_183, %c0_184] : memref<32x128xf32, #tpu.memory_space<vmem>>, vector<32x128xf32>
    %cst_185 = arith.constant dense<0.000000e+00> : vector<8x128xf32>
    %455 = tpu.matmul %453, %454, %cst_185 {dimension_numbers = #tpu.dot_dimension_numbers<[1], [0], [0], [1], [0, 0, 1, 1], [], []>} : vector<8x32xf32>, vector<32x128xf32>, vector<8x128xf32> -> vector<8x128xf32>
    %c0_186 = arith.constant 0 : index
    %c0_187 = arith.constant 0 : index
    %456 = vector.load %arg11[%c0_186, %c0_187] : memref<1x128xf32, #tpu.memory_space<vmem>>, vector<1x128xf32>
    %457 = vector.broadcast %456 : vector<1x128xf32> to vector<8x128xf32>
    %458 = arith.addf %455, %457 : vector<8x128xf32>
    %c0_188 = arith.constant 0 : index
    %c0_189 = arith.constant 0 : index
    %459 = vector.load %arg12[%c0_188, %c0_189] : memref<8x128xf32, #tpu.memory_space<vmem>>, vector<8x128xf32>
    tpu.vector_store %arg12[%c0_188, %c0_189], %458 {strides = array<i32>} : memref<8x128xf32, #tpu.memory_space<vmem>>, vector<8x128xf32>,
    return
  }
}

</mosaic_0001>

<bundles_post_ra>
// kernel: attention_decoder_decode.1
= control target key start
LH: loop header
LB: loop body
LE: loop exit
PB: predicated region body
PF: predicated region fallthrough
CT: control target
= control target key end

     0   :  { %19 = vsyncpa [#allocation4], 0  ;;  %s4179_s0 = inlined_call_operand.vmem [shape: s32[8,1], index: 0, kind: input, shape index: {}]   ;;  %s4180_s1 = inlined_call_operand.vmem [shape: f32[40,32], index: 1, kind: input, shape index: {}]   ;;  %s4181_s2 = inlined_call_operand.vmem [shape: f32[16,32], index: 2, kind: input, shape index: {}]   ;;  %s4182_s3 = inlined_call_operand.vmem [shape: f32[1,32], index: 3, kind: input, shape index: {}]   ;;  %s4183_s4 = inlined_call_operand.vmem [shape: f32[32,128], index: 4, kind: input, shape index: {}]   ;;  %s4184_s5 = inlined_call_operand.vmem [shape: f32[32,128], index: 5, kind: input, shape index: {}]   ;;  %s4185_s6 = inlined_call_operand.vmem [shape: f32[32,96], index: 6, kind: input, shape index: {}]   ;;  %s4186_s7 = inlined_call_operand.vmem [shape: f32[32,128], index: 7, kind: input, shape index: {}]   ;;  %s4187_s8 = inlined_call_operand.hbm [shape: f32[1,16], index: 8, kind: input, shape index: {}]   ;;  %s4188_s9 = inlined_call_operand.vmem [shape: f32[1,96], index: 9, kind: input, shape index: {}]   ;;  %s4189_s10 = inlined_call_operand.vmem [shape: f32[1,96], index: 10, kind: input, shape index: {}]   ;;  %s4190_s11 = inlined_call_operand.vmem [shape: f32[1,128], index: 11, kind: input, shape index: {}]   ;;  %s4191_s12 = inlined_call_operand.hbm [shape: f32[8,128], index: 12, kind: output, shape index: {0}]   ;;  %s4192_s13 = inlined_call_operand.hbm [shape: f32[1,32], index: 13, kind: output, shape index: {1}]  }
   0x1   :  { %20 = vsyncpa [#allocation5], 0 }
   0x2   :  { %21 = vsyncpa [#allocation8], 0  ;;  %s3618_s25 = smov [#allocation3]   ;;  %s3546_s29 = scalar_lea.hbm %s4187_s8, 16 }
   0x3   :  { %s44_s26 = sshll.u32 %s3618_s25, 4  ;;  %p3547_p0 = scmp.ne.s32.totalorder %s4187_s8, %s3546_s29  ;;  %s45_s26 = int_to_ptr.vmem [resolvable:$true] %s44_s26 }
   0x4   :  { %p3550_p1 = scmp.lt.u32.totalorder %s3546_s29, %s4187_s8 }
   0x6   :  { %p3552_p2 = pnand %p3550_p1, %p3547_p0 }
   0x8   :  { %3555 = shalt.err (!%p3552_p2)
}
   0x9   :  { %s3556_s17 = scalar_lea.vmem %s45_s26, 16  ;;  %s3560_s18 = scalar_lea.vmem %s45_s26, 32 }
   0xa   :  { %p3557_p3 = scmp.ne.s32.totalorder %s45_s26, %s3556_s17  ;;  %p3561_p4 = scmp.lt.s32.totalorder %s45_s26, %s45_s26 }
   0xb   :  { %p3562_p5 = scmp.lt.s32.totalorder %s3560_s18, %s3556_s17 }
   0xd   :  { %p3563_p6 = por %p3562_p5, %p3561_p4 }
   0xf   :  { %p3564_p7 = pnand %p3563_p6, %p3557_p3 }
  0x11   :  { %3567 = shalt.err (!%p3564_p7)
}
  0x12   :  { %47 = dma.hbm_to_vmem [thread:$0]  %s4187_s8, 16, %s45_s26, [#allocation4]  }
  0x13   :  { %3612 = dma.done.wait [#allocation4], 16  }
  0x14   :  { %3613 = vsyncadd [#allocation4], 4294967280  ;;  %v3619_v0 = vmov 0   ;;  %v3620_v1 = vmov 0.0|0.0   ;;  %v57_v2 = vld [vmem:[%s4179_s0] sm:$0xff]  ;;  %v66_v4 = vld [vmem:[%s4180_s1 + $0x8] sm:$0xff]  ;;  %v58_v17 = vlaneseq }
  0x15   :  { %3465 = vset.pattern.permute.xlu0 %v3619_v0  ;;  %3317 = vmatprep.subr.bf16.mxu0 %v3620_v1  ;;  %v65_v3 = vld [vmem:[%s4180_s1] sm:$0xff]  ;;  %v67_v6 = vld [vmem:[%s4180_s1 + $0x10] sm:$0xff]  ;;  %v68_v7 = vld [vmem:[%s4180_s1 + $0x18] sm:$0xff]  ;;  %vm3621_vm0 = vmmov 0   ;;  %v3622_v8 = vmov 0.0   ;;  %vm70_vm1 = vcmask 326656  }
  0x16   :  { %3323 = vmatprep.subr.bf16.mxu1 %v3620_v1  ;;  %61 = vperm.xlu0 %3465, %v57_v2   ;;  %v3318_v5 = vpack.c.bf16 %v66_v4, %v65_v3  ;;  %v3321_v9 = vpack.c.bf16 %v68_v7, %v67_v6  ;;  %v144_v10 = vld [vmem:[%s4183_s4] sm:$0xff]  ;;  %v145_v11 = vld [vmem:[%s4183_s4 + $0x8] sm:$0xff]  ;;  %v146_v12 = vld [vmem:[%s4183_s4 + $0x10] sm:$0xff]  ;;  %v59_v18 = vand.u32 127, %v58_v17  ;;  %vm148_vm3 = vcmask 261120   ;;  %s3623_s0 = smov 32  }
  0x17   :  { %3060 = vmatprep.mubr.msk.f32.mxu0 %vm3621_vm0, %v3622_v8  ;;  %3071 = vmatprep.mubr.msk.f32.mxu1 %vm3621_vm0, %v3622_v8  ;;  %v3324_v13 = vpack.c.bf16 %v145_v11, %v144_v10  ;;  %v147_v14 = vld [vmem:[%s4183_s4 + $0x18] sm:$0xff]  ;;  %v69_v16 = vld [vmem:[%s4180_s1 + $0x20] sm:$0xff]  ;;  %v224_v22 = vld [vmem:[%s4184_s5 + $0x8] sm:$0xff]  ;;  %vm303_vm4 = vcmask 122880   ;;  %vm317_vm5 = vcmask 130048   ;;  %s3624_s25 = smov 64  }
  0x18   :  { %3319 = vmatpush3.bf16.msra.mxu0 %v3318_v5  ;;  %v3327_v15 = vpack.c.bf16 %v147_v14, %v146_v12  ;;  %v223_v21 = vld [vmem:[%s4184_s5] sm:$0xff]  ;;  %v225_v24 = vld [vmem:[%s4184_s5 + $0x10] sm:$0xff]  ;;  %v226_v25 = vld [vmem:[%s4184_s5 + $0x18] sm:$0xff]  ;;  %s3625_s27 = smov 96   ;;  %vm530_vm6 = vcmask 253952   ;;  %vm620_vm7 = vcmask 123905  }
  0x19   :  { %3320 = vmatprep.subr.bf16.mxu0 %v3620_v1  ;;  %3325 = vmatpush3.bf16.msra.mxu1 %v3324_v13  ;;  %v3761_v23 = vpack.c.bf16 %v224_v22, %v223_v21  ;;  %v3771_v28 = vpack.c.bf16 %v226_v25, %v225_v24  ;;  %v3780_v29 = vld [vmem:[%s4182_s3] sm:$0x1]  ;;  %v301_v33 = vld [vmem:[#allocation3] sm:$0x1]  ;;  %v393_v53 = vld [vmem:[%s4185_s6 + $0x10] sm:$0xff]  ;;  %vm938_vm8 = vcmask 124930  }
  0x1a   :  { %3326 = vmatprep.subr.bf16.mxu1 %v3620_v1  ;;  %v3797_v43 = vld [vmem:[%s4189_s10] ss:$0 sm:$0xff]  ;;  %v316_v45 = vld [vmem:[%s4181_s2 + $0x8] sm:$0xff]  ;;  %v394_v54 = vld [vmem:[%s4185_s6 + $0x18] sm:$0xff]  ;;  %vm1256_vm9 = vcmask 125955   ;;  %vm1574_vm10 = vcmask 126980  }
  0x1b   :  { %v315_v44 = vld [vmem:[%s4181_s2] sm:$0xff]  ;;  %v392_v49 = vld [vmem:[%s4185_s6 + $0x8] sm:$0xff]  ;;  %v3827_v55 = vpack.c.bf16 %v394_v54, %v393_v53  ;;  %vm1892_vm11 = vcmask 128005   ;;  %vm2210_vm12 = vcmask 129030   ;;  %vm2528_vm13 = vcmask 130055  }
  0x1c   :  { %3322 = vmatpush3.bf16.msra.mxu0 %v3321_v9  ;;  %v3807_v46 = vpack.c.bf16 %v316_v45, %v315_v44  ;;  %v391_v48 = vld [vmem:[%s4185_s6] sm:$0xff]  ;;  %v518_v9 = vshrl.u32 %v58_v17, 7  ;;  %vm845_vm14 = vcmask 254977   ;;  %vm1481_vm15 = vcmask 257027  }
  0x1d   :  { %3058 = vmatprep.subr.mxu0 %v3622_v8  ;;  %3328 = vmatpush3.bf16.msra.mxu1 %v3327_v15  ;;  %v3817_v51 = vpack.c.bf16 %v392_v49, %v391_v48  ;;  %v3843_v60 = vld [vmem:[%s4188_s9] ss:$0 sm:$0xff] }
  0x1e   :  { %3329 = vmatprep.subr.bf16.mxu1 %v3620_v1  ;;  %v519_v10 = vsub.s32 0, %v518_v9 }
  0x20   :  { %3059 = vmatpush3.msra.mxu0 %v69_v16  ;;  %v520_v14 = vrot.slane %v3780_v29, %v519_v10 }
  0x21   :  { %3335 = vmatprep.subr.bf16.mxu0 %v3620_v1 }
  0x95   :  { %v62_v19 = vpop.permute.xlu0 %61 }
  0x96   :  { %vm63_vm2 = vcmp.eq.s32.totalorder %v62_v19, %v59_v18 }
  0x97   :  { %v64_v20 = vsel %vm63_vm2, 1.0, %v3622_v8  ;;  %vm1799_vm2 = vcmask 258052  }
  0x98   :  { %3061 = vmatmul.mubr.msk.f32.vlgmr.msra.gmra.mrb[0].mxu0 %vm70_vm1, %v64_v20  ;;  %vm1163_vm1 = vcmask 256002  }
  0x99   :  { %3089 = vmatprep.mubr.msk.f32.mxu0 %vm3621_vm0, %v3622_v8  ;;  %3337 = vmatpush3.bf16.msra.mxu0 %v3807_v46 }
  0x9a   :  { %3338 = vmatprep.subr.bf16.mxu0 %v3620_v1 }
 0x16b   :  { %v140_v26 = vpop.f32.mrb[0].mxu0 }
 0x16c   :  { %v3062_v27 = vpop.f32.mrb[1].mxu0  ;;  %3072 = vmatmul.mubr.msk.f32.vlgmr.msra.gmra.mrb[0].mxu1 %vm148_vm3, %v140_v26 }
 0x16d   :  { %3331 = vmatpush3.bf16.msra.mxu1 %v3761_v23  ;;  %3082 = vmatprep.mubr.msk.f32.mxu1 %vm3621_vm0, %v3622_v8 }
 0x16e   :  { %3332 = vmatprep.subr.bf16.mxu1 %v3620_v1 }
 0x171   :  { %3334 = vmatpush3.bf16.msra.mxu1 %v3771_v28 }
 0x172   :  { %3344 = vmatprep.subr.bf16.mxu1 %v3620_v1 }
 0x174   :  { %3083 = vmatmul.mubr.msk.f32.vlgmr.msra.gmra.mrb[2].mxu1 %vm148_vm3, %v3780_v29 }
 0x175   :  { %3346 = vmatpush3.bf16.msra.mxu1 %v3761_v23  ;;  %3111 = vmatprep.mubr.msk.f32.mxu1 %vm3621_vm0, %v3622_v8 }
 0x176   :  { %3347 = vmatprep.subr.bf16.mxu1 %v3620_v1 }
 0x179   :  { %3349 = vmatpush3.bf16.msra.mxu1 %v3771_v28 }
 0x17a   :  { %3353 = vmatprep.subr.bf16.mxu1 %v3620_v1 }
 0x23f   :  { %v3791_v30 = vpop.f32.mrb[0].mxu1 }
 0x240   :  { %v3073_v31 = vpop.f32.mrb[1].mxu1 }
 0x241   :  { %v3865_v31 = vld [vmem:[#allocation3] ss:$0 sm:$0xff] }
 0x247   :  { %v296_v32 = vpop.f32.mrb[2].mxu1 }
 0x248   :  { %v300_v34 = vadd.f32 %v296_v32, %v3791_v30  ;;  %v3084_v35 = vpop.f32.mrb[3].mxu1 }
 0x24a   :  { %v302_v36 = vadd.f32 %v301_v33, %v300_v34 }
 0x24c   :  { %v304_v37 = vsel %vm303_vm4, %v302_v36, -inf }
 0x24d   :  { %305 = vmax.xlane.f32.xlu0 %v304_v37 }
 0x2da   :  { %v306_v38 = vpop.xlane.xlu0 %305 }
 0x2db   :  { %v307_v39 = vsub.f32 %v302_v36, %v306_v38 }
 0x2dd   :  { %v308_v40 = vmul.f32 1.442695, %v307_v39 }
 0x2df   :  { %3466 = vpow2.f32 %v308_v40 }
 0x2e9   :  { %v3467_v41 = vpop.eup %3466 }
 0x2ea   :  { %v310_v42 = vsel %vm303_vm4, %v3467_v41, 0.0  ;;  %vm2435_vm4 = vcmask 260102  }
 0x2eb   :  { %311 = vadd.xlane.f32.xlu1 %v310_v42 }
 0x2fc   :  { %489 = vrot.lane.b32.xlu1 %v3797_v43, %s3623_s0 }
 0x378   :  { %v312_v47 = vpop.xlane.xlu1 %311 }
 0x379   :  { %3468 = vrcp.f32 %v312_v47 }
 0x37c   :  { %v490_v61 = vpop.permute.xlu1 %489 }
 0x37d   :  { %v492_v62 = vadd.f32 %v490_v61, %v296_v32 }
 0x383   :  { %v3469_v50 = vpop.eup %3468 }
 0x384   :  { %v314_v52 = vmul.f32 %v3469_v50, %v3467_v41 }
 0x386   :  { %3090 = vmatmul.mubr.msk.f32.vlgmr.msra.gmra.mrb[2].mxu0 %vm317_vm5, %v314_v52 }
 0x387   :  { %3340 = vmatpush3.bf16.msra.mxu0 %v3817_v51  ;;  %3100 = vmatprep.mubr.msk.f32.mxu0 %vm3621_vm0, %v3622_v8 }
 0x388   :  { %3341 = vmatprep.subr.bf16.mxu0 %v3620_v1 }
 0x38b   :  { %3343 = vmatpush3.bf16.msra.mxu0 %v3827_v55 }
 0x38c   :  { %3350 = vmatprep.subr.bf16.mxu0 %v3620_v1 }
 0x459   :  { %v387_v56 = vpop.f32.mrb[2].mxu0 }
 0x45a   :  { %v3091_v57 = vpop.f32.mrb[3].mxu0  ;;  %3101 = vmatmul.mubr.msk.f32.vlgmr.msra.gmra.mrb[4].mxu0 %vm148_vm3, %v387_v56 }
 0x45b   :  { %3352 = vmatpush3.bf16.msra.mxu0 %v3807_v46  ;;  %3118 = vmatprep.mubr.msk.f32.mxu0 %vm3621_vm0, %v3622_v8 }
 0x45c   :  { %3359 = vmatprep.subr.bf16.mxu0 %v3620_v1 }
 0x52d   :  { %v464_v58 = vpop.f32.mrb[4].mxu0 }
 0x52e   :  { %469 = vrot.lane.b32.xlu1 %v464_v58, %s3623_s0  ;;  %v3102_v59 = vpop.f32.mrb[5].mxu0 }
 0x532   :  { %479 = vrot.lane.b32.xlu1 %v3843_v60, %s3623_s0 }
 0x536   :  { %501 = vrot.lane.b32.xlu1 %v492_v62, %s3624_s25 }
 0x5a0   :  { %v470_v63 = vpop.permute.xlu1 %469 }
 0x5a1   :  { %v472_v0 = vadd.f32 %v470_v63, %v3791_v30 }
 0x5a4   :  { %v480_v2 = vpop.permute.xlu1 %479 }
 0x5a5   :  { %v482_v3 = vadd.f32 %v480_v2, %v472_v0 }
 0x5a7   :  { %v493_v4 = vadd.f32 %v492_v62, %v482_v3 }
 0x5a8   :  { %v502_v12 = vpop.permute.xlu1 %501 }
 0x5a9   :  { %v2878_v5 = vmul.f32 -1.442695, %v493_v4 }
 0x5ab   :  { %3470 = vpow2.f32 %v2878_v5 }
 0x5b5   :  { %v3471_v6 = vpop.eup %3470 }
 0x5b6   :  { %v497_v7 = vadd.f32 1.0, %v3471_v6 }
 0x5b8   :  { %3472 = vrcp.f32 %v497_v7 }
 0x5c2   :  { %v3473_v11 = vpop.eup %3472 }
 0x5c3   :  { %v504_v13 = vmul.f32 %v3473_v11, %v502_v12  ;;  %v511_v20 = vsub.f32 1.0, %v3473_v11 }
 0x5c5   :  { %506 = vrot.lane.b32.xlu1 %v504_v13, %s3624_s25 }
 0x5c9   :  { %521 = vrot.lane.b32.xlu1 %v520_v14, %s3624_s25 }
 0x637   :  { %v507_v15 = vpop.permute.xlu1 %506 }
 0x638   :  { %v509_v16 = vadd.f32 %v507_v15, %v482_v3 }
 0x63a   :  { %3474 = vtanh.f32 %v509_v16 }
 0x63b   :  { %v522_v19 = vpop.permute.xlu1 %521 }
 0x63c   :  { %v524_v21 = vmul.f32 %v3473_v11, %v522_v19 }
 0x644   :  { %v3475_v18 = vpop.eup %3474 }
 0x645   :  { %513 = vrot.lane.b32.xlu0 %v3475_v18, %s3625_s27 }
 0x6b7   :  { %v514_v17 = vpop.permute.xlu0 %513 }
 0x6b8   :  { %v516_v22 = vmul.f32 %v514_v17, %v511_v20 }
 0x6ba   :  { %v3854_v24 = vadd.f32 %v524_v21, %v516_v22 }
 0x6bc   :  { %527 = vrot.lane.b32.xlu1 %v3854_v24, %s3624_s25  ;;  %v837_v2 = vrot.slane %v3854_v24, 7 }
 0x72e   :  { %v528_v25 = vpop.permute.xlu1 %527 }
 0x72f   :  { %531 = vst.msk [vmem:[#allocation2] sm:$0x1] %vm530_vm6, %v528_v25  ;;  %3112 = vmatmul.mubr.msk.f32.vlgmr.msra.gmra.mrb[4].mxu1 %vm148_vm3, %v528_v25 }
 0x730   :  { %3355 = vmatpush3.bf16.msra.mxu1 %v3817_v51  ;;  %3129 = vmatprep.mubr.msk.f32.mxu1 %vm3621_vm0, %v3622_v8 }
 0x731   :  { %3356 = vmatprep.subr.bf16.mxu1 %v3620_v1 }
 0x734   :  { %3358 = vmatpush3.bf16.msra.mxu1 %v3827_v55 }
 0x735   :  { %3365 = vmatprep.subr.bf16.mxu1 %v3620_v1 }
 0x802   :  { %v604_v26 = vpop.f32.mrb[4].mxu1 }
 0x803   :  { %v609_v27 = vrot.slane %v604_v26, 7  ;;  %v3113_v29 = vpop.f32.mrb[5].mxu1 }
 0x805   :  { %v611_v32 = vadd.f32 %v609_v27, %v3791_v30 }
 0x807   :  { %v619_v33 = vadd.f32 %v3865_v31, %v611_v32 }
 0x809   :  { %v621_v34 = vsel %vm620_vm7, %v619_v33, -inf }
 0x80a   :  { %622 = vmax.xlane.f32.xlu1 %v621_v34 }
 0x81b   :  { %807 = vrot.lane.b32.xlu1 %v3797_v43, %s3623_s0 }
 0x81f   :  { %797 = vrot.lane.b32.xlu1 %v3843_v60, %s3623_s0 }
 0x897   :  { %v623_v35 = vpop.xlane.xlu1 %622 }
 0x898   :  { %v624_v36 = vsub.f32 %v619_v33, %v623_v35 }
 0x89a   :  { %v625_v37 = vmul.f32 1.442695, %v624_v36 }
 0x89b   :  { %v808_v38 = vpop.permute.xlu1 %807 }
 0x89c   :  { %3476 = vpow2.f32 %v625_v37  ;;  %v810_v39 = vadd.f32 %v808_v38, %v604_v26 }
 0x89e   :  { %v812_v40 = vrot.slane %v810_v39, 7 }
 0x89f   :  { %v798_v58 = vpop.permute.xlu1 %797 }
 0x8a0   :  { %821 = vrot.lane.b32.xlu1 %v812_v40, %s3624_s25 }
 0x8a6   :  { %v3477_v41 = vpop.eup %3476 }
 0x8a7   :  { %v627_v42 = vsel %vm620_vm7, %v3477_v41, 0.0 }
 0x8a8   :  { %628 = vadd.xlane.f32.xlu0 %v627_v42 }
 0x912   :  { %v822_v4 = vpop.permute.xlu1 %821 }
 0x935   :  { %v629_v44 = vpop.xlane.xlu0 %628 }
 0x936   :  { %3478 = vrcp.f32 %v629_v44 }
 0x940   :  { %v3479_v45 = vpop.eup %3478 }
 0x941   :  { %v631_v47 = vmul.f32 %v3479_v45, %v3477_v41 }
 0x943   :  { %v635_v48 = vrot.slane %v631_v47, 1 }
 0x945   :  { %3119 = vmatmul.mubr.msk.f32.vlgmr.msra.gmra.mrb[6].mxu0 %vm317_vm5, %v635_v48 }
 0x946   :  { %3361 = vmatpush3.bf16.msra.mxu0 %v3761_v23  ;;  %3140 = vmatprep.mubr.msk.f32.mxu0 %vm3621_vm0, %v3622_v8 }
 0x947   :  { %3362 = vmatprep.subr.bf16.mxu0 %v3620_v1 }
 0x94a   :  { %3364 = vmatpush3.bf16.msra.mxu0 %v3771_v28 }
 0x94b   :  { %3368 = vmatprep.subr.bf16.mxu0 %v3620_v1 }
 0xa18   :  { %v704_v49 = vpop.f32.mrb[6].mxu0 }
 0xa19   :  { %v3120_v50 = vpop.f32.mrb[7].mxu0  ;;  %3130 = vmatmul.mubr.msk.f32.vlgmr.msra.gmra.mrb[6].mxu1 %vm148_vm3, %v704_v49 }
 0xa1a   :  { %3367 = vmatpush3.bf16.msra.mxu1 %v3807_v46  ;;  %3147 = vmatprep.mubr.msk.f32.mxu1 %vm3621_vm0, %v3622_v8 }
 0xa1b   :  { %3374 = vmatprep.subr.bf16.mxu1 %v3620_v1 }
 0xaec   :  { %v781_v52 = vpop.f32.mrb[6].mxu1 }
 0xaed   :  { %v786_v53 = vrot.slane %v781_v52, 7  ;;  %v3131_v54 = vpop.f32.mrb[7].mxu1 }
 0xaef   :  { %787 = vrot.lane.b32.xlu0 %v786_v53, %s3623_s0 }
 0xb61   :  { %v788_v56 = vpop.permute.xlu0 %787 }
 0xb62   :  { %v790_v57 = vadd.f32 %v788_v56, %v3791_v30 }
 0xb64   :  { %v800_v59 = vadd.f32 %v798_v58, %v790_v57 }
 0xb66   :  { %v814_v61 = vadd.f32 %v812_v40, %v800_v59 }
 0xb68   :  { %v2885_v62 = vmul.f32 -1.442695, %v814_v61 }
 0xb6a   :  { %3480 = vpow2.f32 %v2885_v62 }
 0xb74   :  { %v3481_v63 = vpop.eup %3480 }
 0xb75   :  { %v818_v0 = vadd.f32 1.0, %v3481_v63 }
 0xb77   :  { %3482 = vrcp.f32 %v818_v0 }
 0xb81   :  { %v3483_v3 = vpop.eup %3482 }
 0xb82   :  { %v824_v5 = vmul.f32 %v3483_v3, %v822_v4  ;;  %v839_v6 = vmul.f32 %v3483_v3, %v837_v2  ;;  %v831_v11 = vsub.f32 1.0, %v3483_v3 }
 0xb84   :  { %826 = vrot.lane.b32.xlu1 %v824_v5, %s3624_s25 }
 0xbf6   :  { %v827_v7 = vpop.permute.xlu1 %826 }
 0xbf7   :  { %v829_v9 = vadd.f32 %v827_v7, %v800_v59 }
 0xbf9   :  { %3484 = vtanh.f32 %v829_v9 }
 0xc03   :  { %v3485_v10 = vpop.eup %3484 }
 0xc04   :  { %833 = vrot.lane.b32.xlu0 %v3485_v10, %s3625_s27 }
 0xc76   :  { %v834_v12 = vpop.permute.xlu0 %833 }
 0xc77   :  { %v836_v13 = vmul.f32 %v834_v12, %v831_v11 }
 0xc79   :  { %v3891_v14 = vadd.f32 %v839_v6, %v836_v13 }
 0xc7b   :  { %v851_v15 = vrot.slane %v3891_v14, 1  ;;  %v1155_v0 = vrot.slane %v3891_v14, 7 }
 0xc7d   :  { %852 = vrot.lane.b32.xlu1 %v851_v15, %s3624_s25 }
 0xcef   :  { %v853_v16 = vpop.permute.xlu1 %852 }
 0xcf0   :  { %3141 = vmatmul.mubr.msk.f32.vlgmr.msra.gmra.mrb[8].mxu0 %vm148_vm3, %v853_v16 }
 0xcf1   :  { %3370 = vmatpush3.bf16.msra.mxu0 %v3817_v51  ;;  %3158 = vmatprep.mubr.msk.f32.mxu0 %vm3621_vm0, %v3622_v8 }
 0xcf2   :  { %3371 = vmatprep.subr.bf16.mxu0 %v3620_v1 }
 0xcf5   :  { %3373 = vmatpush3.bf16.msra.mxu0 %v3827_v55 }
 0xcf6   :  { %3380 = vmatprep.subr.bf16.mxu0 %v3620_v1 }
 0xdc3   :  { %v922_v18 = vpop.f32.mrb[8].mxu0 }
 0xdc4   :  { %v927_v19 = vrot.slane %v922_v18, 6  ;;  %v3142_v20 = vpop.f32.mrb[9].mxu0 }
 0xdc6   :  { %v929_v17 = vadd.f32 %v927_v19, %v3791_v30 }
 0xdc8   :  { %v937_v21 = vadd.f32 %v3865_v31, %v929_v17 }
 0xdca   :  { %v939_v22 = vsel %vm938_vm8, %v937_v21, -inf }
 0xdcb   :  { %940 = vmax.xlane.f32.xlu0 %v939_v22 }
 0xde1   :  { %1125 = vrot.lane.b32.xlu0 %v3797_v43, %s3623_s0 }
 0xde5   :  { %1115 = vrot.lane.b32.xlu0 %v3843_v60, %s3623_s0 }
 0xe58   :  { %v941_v24 = vpop.xlane.xlu0 %940 }
 0xe59   :  { %v942_v25 = vsub.f32 %v937_v21, %v941_v24 }
 0xe5b   :  { %v943_v26 = vmul.f32 1.442695, %v942_v25 }
 0xe5c   :  { %v1126_v38 = vpop.permute.xlu0 %1125 }
 0xe5d   :  { %3486 = vpow2.f32 %v943_v26  ;;  %v1128_v40 = vadd.f32 %v1126_v38, %v922_v18 }
 0xe5f   :  { %v1130_v44 = vrot.slane %v1128_v40, 6 }
 0xe60   :  { %v1116_v47 = vpop.permute.xlu0 %1115 }
 0xe67   :  { %v3487_v27 = vpop.eup %3486 }
 0xe68   :  { %v945_v29 = vsel %vm938_vm8, %v3487_v27, 0.0 }
 0xe69   :  { %946 = vadd.xlane.f32.xlu1 %v945_v29 }
 0xef6   :  { %v947_v32 = vpop.xlane.xlu1 %946 }
 0xef7   :  { %3488 = vrcp.f32 %v947_v32 }
 0xf01   :  { %v3489_v33 = vpop.eup %3488 }
 0xf02   :  { %v949_v34 = vmul.f32 %v3489_v33, %v3487_v27 }
 0xf04   :  { %v953_v35 = vrot.slane %v949_v34, 2 }
 0xf06   :  { %3148 = vmatmul.mubr.msk.f32.vlgmr.msra.gmra.mrb[8].mxu1 %vm317_vm5, %v953_v35 }
 0xf07   :  { %3376 = vmatpush3.bf16.msra.mxu1 %v3761_v23  ;;  %3169 = vmatprep.mubr.msk.f32.mxu1 %vm3621_vm0, %v3622_v8 }
 0xf08   :  { %3377 = vmatprep.subr.bf16.mxu1 %v3620_v1 }
 0xf0b   :  { %3379 = vmatpush3.bf16.msra.mxu1 %v3771_v28 }
 0xf0c   :  { %3383 = vmatprep.subr.bf16.mxu1 %v3620_v1 }
 0xfd9   :  { %v1022_v36 = vpop.f32.mrb[8].mxu1 }
 0xfda   :  { %v3149_v37 = vpop.f32.mrb[9].mxu1  ;;  %3159 = vmatmul.mubr.msk.f32.vlgmr.msra.gmra.mrb[10].mxu0 %vm148_vm3, %v1022_v36 }
 0xfdb   :  { %3382 = vmatpush3.bf16.msra.mxu0 %v3807_v46  ;;  %3176 = vmatprep.mubr.msk.f32.mxu0 %vm3621_vm0, %v3622_v8 }
 0xfdc   :  { %3389 = vmatprep.subr.bf16.mxu0 %v3620_v1 }
0x10ad   :  { %v1099_v39 = vpop.f32.mrb[10].mxu0 }
0x10ae   :  { %v1104_v41 = vrot.slane %v1099_v39, 6  ;;  %v3160_v42 = vpop.f32.mrb[11].mxu0 }
0x10b0   :  { %1105 = vrot.lane.b32.xlu1 %v1104_v41, %s3623_s0 }
0x10b4   :  { %1139 = vrot.lane.b32.xlu1 %v1130_v44, %s3624_s25 }
0x1122   :  { %v1106_v45 = vpop.permute.xlu1 %1105 }
0x1123   :  { %v1108_v48 = vadd.f32 %v1106_v45, %v3791_v30 }
0x1125   :  { %v1118_v49 = vadd.f32 %v1116_v47, %v1108_v48 }
0x1126   :  { %v1140_v57 = vpop.permute.xlu1 %1139 }
0x1127   :  { %v1132_v50 = vadd.f32 %v1130_v44, %v1118_v49 }
0x1129   :  { %v2892_v52 = vmul.f32 -1.442695, %v1132_v50 }
0x112b   :  { %3490 = vpow2.f32 %v2892_v52 }
0x1135   :  { %v3491_v53 = vpop.eup %3490 }
0x1136   :  { %v1136_v54 = vadd.f32 1.0, %v3491_v53 }
0x1138   :  { %3492 = vrcp.f32 %v1136_v54 }
0x1142   :  { %v3493_v56 = vpop.eup %3492 }
0x1143   :  { %v1142_v58 = vmul.f32 %v3493_v56, %v1140_v57  ;;  %v1149_v63 = vsub.f32 1.0, %v3493_v56  ;;  %v1157_v3 = vmul.f32 %v3493_v56, %v1155_v0 }
0x1145   :  { %1144 = vrot.lane.b32.xlu0 %v1142_v58, %s3624_s25 }
0x11b7   :  { %v1145_v59 = vpop.permute.xlu0 %1144 }
0x11b8   :  { %v1147_v61 = vadd.f32 %v1145_v59, %v1118_v49 }
0x11ba   :  { %3494 = vtanh.f32 %v1147_v61 }
0x11c4   :  { %v3495_v62 = vpop.eup %3494 }
0x11c5   :  { %1151 = vrot.lane.b32.xlu1 %v3495_v62, %s3625_s27 }
0x1237   :  { %v1152_v2 = vpop.permute.xlu1 %1151 }
0x1238   :  { %v1154_v4 = vmul.f32 %v1152_v2, %v1149_v63 }
0x123a   :  { %v3926_v5 = vadd.f32 %v1157_v3, %v1154_v4 }
0x123c   :  { %v1169_v6 = vrot.slane %v3926_v5, 2  ;;  %v1473_v56 = vrot.slane %v3926_v5, 7 }
0x123e   :  { %1170 = vrot.lane.b32.xlu0 %v1169_v6, %s3624_s25 }
0x12b0   :  { %v1171_v7 = vpop.permute.xlu0 %1170 }
0x12b1   :  { %3170 = vmatmul.mubr.msk.f32.vlgmr.msra.gmra.mrb[10].mxu1 %vm148_vm3, %v1171_v7 }
0x12b2   :  { %3385 = vmatpush3.bf16.msra.mxu1 %v3817_v51  ;;  %3187 = vmatprep.mubr.msk.f32.mxu1 %vm3621_vm0, %v3622_v8 }
0x12b3   :  { %3386 = vmatprep.subr.bf16.mxu1 %v3620_v1 }
0x12b6   :  { %3388 = vmatpush3.bf16.msra.mxu1 %v3827_v55 }
0x12b7   :  { %3395 = vmatprep.subr.bf16.mxu1 %v3620_v1 }
0x1384   :  { %v1240_v9 = vpop.f32.mrb[10].mxu1 }
0x1385   :  { %v1245_v10 = vrot.slane %v1240_v9, 5  ;;  %v3171_v11 = vpop.f32.mrb[11].mxu1 }
0x1387   :  { %v1247_v12 = vadd.f32 %v1245_v10, %v3791_v30 }
0x1389   :  { %v1255_v13 = vadd.f32 %v3865_v31, %v1247_v12 }
0x138b   :  { %v1257_v15 = vsel %vm1256_vm9, %v1255_v13, -inf }
0x138c   :  { %1258 = vmax.xlane.f32.xlu1 %v1257_v15 }
0x1419   :  { %v1259_v16 = vpop.xlane.xlu1 %1258 }
0x141a   :  { %v1260_v18 = vsub.f32 %v1255_v13, %v1259_v16 }
0x141c   :  { %v1261_v19 = vmul.f32 1.442695, %v1260_v18 }
0x141e   :  { %3496 = vpow2.f32 %v1261_v19 }
0x1428   :  { %v3497_v20 = vpop.eup %3496 }
0x1429   :  { %v1263_v17 = vsel %vm1256_vm9, %v3497_v20, 0.0 }
0x142a   :  { %1264 = vadd.xlane.f32.xlu0 %v1263_v17 }
0x1440   :  { %1443 = vrot.lane.b32.xlu0 %v3797_v43, %s3623_s0 }
0x14b7   :  { %v1265_v21 = vpop.xlane.xlu0 %1264 }
0x14b8   :  { %3498 = vrcp.f32 %v1265_v21 }
0x14bb   :  { %v1444_v22 = vpop.permute.xlu0 %1443 }
0x14bc   :  { %v1446_v24 = vadd.f32 %v1444_v22, %v1240_v9 }
0x14be   :  { %v1448_v25 = vrot.slane %v1446_v24, 5 }
0x14c0   :  { %1457 = vrot.lane.b32.xlu0 %v1448_v25, %s3624_s25 }
0x14c2   :  { %v3499_v26 = vpop.eup %3498 }
0x14c3   :  { %v1267_v27 = vmul.f32 %v3499_v26, %v3497_v20 }
0x14c5   :  { %v1271_v29 = vrot.slane %v1267_v27, 3 }
0x14c7   :  { %3177 = vmatmul.mubr.msk.f32.vlgmr.msra.gmra.mrb[12].mxu0 %vm317_vm5, %v1271_v29 }
0x14c8   :  { %3391 = vmatpush3.bf16.msra.mxu0 %v3761_v23  ;;  %3198 = vmatprep.mubr.msk.f32.mxu0 %vm3621_vm0, %v3622_v8 }
0x14c9   :  { %3392 = vmatprep.subr.bf16.mxu0 %v3620_v1 }
0x14cc   :  { %3394 = vmatpush3.bf16.msra.mxu0 %v3771_v28 }
0x14cd   :  { %3398 = vmatprep.subr.bf16.mxu0 %v3620_v1 }
0x1532   :  { %v1458_v48 = vpop.permute.xlu0 %1457 }
0x159a   :  { %v1340_v32 = vpop.f32.mrb[12].mxu0 }
0x159b   :  { %v3178_v33 = vpop.f32.mrb[13].mxu0  ;;  %3188 = vmatmul.mubr.msk.f32.vlgmr.msra.gmra.mrb[12].mxu1 %vm148_vm3, %v1340_v32 }
0x159c   :  { %3397 = vmatpush3.bf16.msra.mxu1 %v3807_v46  ;;  %3205 = vmatprep.mubr.msk.f32.mxu1 %vm3621_vm0, %v3622_v8 }
0x159d   :  { %3404 = vmatprep.subr.bf16.mxu1 %v3620_v1 }
0x166e   :  { %v1417_v34 = vpop.f32.mrb[12].mxu1 }
0x166f   :  { %v1422_v35 = vrot.slane %v1417_v34, 5  ;;  %v3189_v36 = vpop.f32.mrb[13].mxu1 }
0x1671   :  { %1423 = vrot.lane.b32.xlu1 %v1422_v35, %s3623_s0 }
0x1675   :  { %1433 = vrot.lane.b32.xlu1 %v3843_v60, %s3623_s0 }
0x16e3   :  { %v1424_v37 = vpop.permute.xlu1 %1423 }
0x16e4   :  { %v1426_v38 = vadd.f32 %v1424_v37, %v3791_v30 }
0x16e7   :  { %v1434_v39 = vpop.permute.xlu1 %1433 }
0x16e8   :  { %v1436_v40 = vadd.f32 %v1434_v39, %v1426_v38 }
0x16ea   :  { %v1450_v41 = vadd.f32 %v1448_v25, %v1436_v40 }
0x16ec   :  { %v2899_v42 = vmul.f32 -1.442695, %v1450_v41 }
0x16ee   :  { %3500 = vpow2.f32 %v2899_v42 }
0x16f8   :  { %v3501_v44 = vpop.eup %3500 }
0x16f9   :  { %v1454_v45 = vadd.f32 1.0, %v3501_v44 }
0x16fb   :  { %3502 = vrcp.f32 %v1454_v45 }
0x1705   :  { %v3503_v47 = vpop.eup %3502 }
0x1706   :  { %v1460_v49 = vmul.f32 %v3503_v47, %v1458_v48  ;;  %v1467_v54 = vsub.f32 1.0, %v3503_v47  ;;  %v1475_v58 = vmul.f32 %v3503_v47, %v1473_v56 }
0x1708   :  { %1462 = vrot.lane.b32.xlu1 %v1460_v49, %s3624_s25 }
0x177a   :  { %v1463_v50 = vpop.permute.xlu1 %1462 }
0x177b   :  { %v1465_v52 = vadd.f32 %v1463_v50, %v1436_v40 }
0x177d   :  { %3504 = vtanh.f32 %v1465_v52 }
0x1787   :  { %v3505_v53 = vpop.eup %3504 }
0x1788   :  { %1469 = vrot.lane.b32.xlu0 %v3505_v53, %s3625_s27 }
0x17fa   :  { %v1470_v57 = vpop.permute.xlu0 %1469 }
0x17fb   :  { %v1472_v59 = vmul.f32 %v1470_v57, %v1467_v54 }
0x17fd   :  { %v3961_v61 = vadd.f32 %v1475_v58, %v1472_v59 }
0x17ff   :  { %v1487_v62 = vrot.slane %v3961_v61, 3  ;;  %v1791_v44 = vrot.slane %v3961_v61, 7 }
0x1801   :  { %1488 = vrot.lane.b32.xlu1 %v1487_v62, %s3624_s25 }
0x1873   :  { %v1489_v63 = vpop.permute.xlu1 %1488 }
0x1874   :  { %3199 = vmatmul.mubr.msk.f32.vlgmr.msra.gmra.mrb[14].mxu0 %vm148_vm3, %v1489_v63 }
0x1875   :  { %3400 = vmatpush3.bf16.msra.mxu0 %v3817_v51  ;;  %3216 = vmatprep.mubr.msk.f32.mxu0 %vm3621_vm0, %v3622_v8 }
0x1876   :  { %3401 = vmatprep.subr.bf16.mxu0 %v3620_v1 }
0x1879   :  { %3403 = vmatpush3.bf16.msra.mxu0 %v3827_v55 }
0x187a   :  { %3410 = vmatprep.subr.bf16.mxu0 %v3620_v1 }
0x1947   :  { %v1558_v0 = vpop.f32.mrb[14].mxu0 }
0x1948   :  { %v1563_v2 = vrot.slane %v1558_v0, 4  ;;  %v3200_v3 = vpop.f32.mrb[15].mxu0 }
0x194a   :  { %v1565_v4 = vadd.f32 %v1563_v2, %v3791_v30 }
0x194c   :  { %v1573_v6 = vadd.f32 %v3865_v31, %v1565_v4 }
0x194e   :  { %v1575_v7 = vsel %vm1574_vm10, %v1573_v6, -inf }
0x194f   :  { %1576 = vmax.xlane.f32.xlu0 %v1575_v7 }
0x1965   :  { %1761 = vrot.lane.b32.xlu0 %v3797_v43, %s3623_s0 }
0x1969   :  { %1751 = vrot.lane.b32.xlu0 %v3843_v60, %s3623_s0 }
0x19dc   :  { %v1577_v9 = vpop.xlane.xlu0 %1576 }
0x19dd   :  { %v1578_v10 = vsub.f32 %v1573_v6, %v1577_v9 }
0x19df   :  { %v1579_v11 = vmul.f32 1.442695, %v1578_v10 }
0x19e1   :  { %3506 = vpow2.f32 %v1579_v11 }
0x19eb   :  { %v3507_v12 = vpop.eup %3506 }
0x19ec   :  { %v1581_v13 = vsel %vm1574_vm10, %v3507_v12, 0.0 }
0x19ed   :  { %1582 = vadd.xlane.f32.xlu1 %v1581_v13 }
0x1a7a   :  { %v1583_v15 = vpop.xlane.xlu1 %1582 }
0x1a7b   :  { %3508 = vrcp.f32 %v1583_v15 }
0x1a85   :  { %v3509_v16 = vpop.eup %3508 }
0x1a86   :  { %v1585_v18 = vmul.f32 %v3509_v16, %v3507_v12 }
0x1a88   :  { %v1589_v19 = vrot.slane %v1585_v18, 4 }
0x1a8a   :  { %3206 = vmatmul.mubr.msk.f32.vlgmr.msra.gmra.mrb[14].mxu1 %vm317_vm5, %v1589_v19 }
0x1a8b   :  { %3406 = vmatpush3.bf16.msra.mxu1 %v3761_v23  ;;  %3227 = vmatprep.mubr.msk.f32.mxu1 %vm3621_vm0, %v3622_v8  ;;  %v1762_v23 = vpop.permute.xlu0 %1761 }
0x1a8c   :  { %3407 = vmatprep.subr.bf16.mxu1 %v3620_v1  ;;  %v1764_v22 = vadd.f32 %v1762_v23, %v1558_v0 }
0x1a8f   :  { %3409 = vmatpush3.bf16.msra.mxu1 %v3771_v28  ;;  %v1766_v28 = vrot.slane %v1764_v22, 4  ;;  %v1752_v27 = vpop.permute.xlu0 %1751 }
0x1a90   :  { %3413 = vmatprep.subr.bf16.mxu1 %v3620_v1 }
0x1b5d   :  { %v1658_v20 = vpop.f32.mrb[14].mxu1 }
0x1b5e   :  { %v3207_v17 = vpop.f32.mrb[15].mxu1  ;;  %3217 = vmatmul.mubr.msk.f32.vlgmr.msra.gmra.mrb[16].mxu0 %vm148_vm3, %v1658_v20 }
0x1b5f   :  { %3412 = vmatpush3.bf16.msra.mxu0 %v3807_v46  ;;  %3234 = vmatprep.mubr.msk.f32.mxu0 %vm3621_vm0, %v3622_v8 }
0x1b60   :  { %3419 = vmatprep.subr.bf16.mxu0 %v3620_v1 }
0x1c31   :  { %v1735_v21 = vpop.f32.mrb[16].mxu0 }
0x1c32   :  { %v1740_v24 = vrot.slane %v1735_v21, 4  ;;  %v3218_v25 = vpop.f32.mrb[17].mxu0 }
0x1c34   :  { %1741 = vrot.lane.b32.xlu1 %v1740_v24, %s3623_s0 }
0x1c38   :  { %1775 = vrot.lane.b32.xlu1 %v1766_v28, %s3624_s25 }
0x1ca6   :  { %v1742_v26 = vpop.permute.xlu1 %1741 }
0x1ca7   :  { %v1744_v29 = vadd.f32 %v1742_v26, %v3791_v30 }
0x1ca9   :  { %v1754_v46 = vadd.f32 %v1752_v27, %v1744_v29  ;;  %v2120_v29 = vld [vmem:[%s4184_s5 + $0x8] sm:$0xff] }
0x1caa   :  { %v1776_v37 = vpop.permute.xlu1 %1775 }
0x1cab   :  { %v1768_v32 = vadd.f32 %v1766_v28, %v1754_v46 }
0x1cad   :  { %v2906_v33 = vmul.f32 -1.442695, %v1768_v32 }
0x1caf   :  { %3510 = vpow2.f32 %v2906_v33  ;;  %v2122_v33 = vld [vmem:[%s4184_s5 + $0x18] sm:$0xff] }
0x1cb9   :  { %v3511_v34 = vpop.eup %3510 }
0x1cba   :  { %v1772_v35 = vadd.f32 1.0, %v3511_v34 }
0x1cbc   :  { %3512 = vrcp.f32 %v1772_v35 }
0x1cc6   :  { %v3513_v36 = vpop.eup %3512 }
0x1cc7   :  { %v1778_v38 = vmul.f32 %v3513_v36, %v1776_v37  ;;  %v1785_v42 = vsub.f32 1.0, %v3513_v36  ;;  %v1793_v47 = vmul.f32 %v3513_v36, %v1791_v44 }
0x1cc9   :  { %1780 = vrot.lane.b32.xlu0 %v1778_v38, %s3624_s25 }
0x1d3b   :  { %v1781_v39 = vpop.permute.xlu0 %1780 }
0x1d3c   :  { %v1783_v40 = vadd.f32 %v1781_v39, %v1754_v46  ;;  %v2121_v46 = vld [vmem:[%s4184_s5 + $0x10] sm:$0xff] }
0x1d3d   :  { %v3423_v34 = vpack.c.bf16 %v2122_v33, %v2121_v46 }
0x1d3e   :  { %3514 = vtanh.f32 %v1783_v40 }
0x1d48   :  { %v3515_v41 = vpop.eup %3514 }
0x1d49   :  { %1787 = vrot.lane.b32.xlu1 %v3515_v41, %s3625_s27 }
0x1dbb   :  { %v1788_v45 = vpop.permute.xlu1 %1787 }
0x1dbc   :  { %v1790_v48 = vmul.f32 %v1788_v45, %v1785_v42 }
0x1dbe   :  { %v3996_v49 = vadd.f32 %v1793_v47, %v1790_v48 }
0x1dc0   :  { %v1805_v50 = vrot.slane %v3996_v49, 4  ;;  %v2109_v37 = vrot.slane %v3996_v49, 7 }
0x1dc2   :  { %1806 = vrot.lane.b32.xlu0 %v1805_v50, %s3624_s25 }
0x1e34   :  { %v1807_v52 = vpop.permute.xlu0 %1806 }
0x1e35   :  { %3228 = vmatmul.mubr.msk.f32.vlgmr.msra.gmra.mrb[16].mxu1 %vm148_vm3, %v1807_v52 }
0x1e36   :  { %3415 = vmatpush3.bf16.msra.mxu1 %v3817_v51  ;;  %3245 = vmatprep.mubr.msk.f32.mxu1 %vm3621_vm0, %v3622_v8 }
0x1e37   :  { %3416 = vmatprep.subr.bf16.mxu1 %v3620_v1 }
0x1e3a   :  { %3418 = vmatpush3.bf16.msra.mxu1 %v3827_v55 }
0x1e3b   :  { %3425 = vmatprep.subr.bf16.mxu1 %v3620_v1 }
0x1f08   :  { %v1876_v53 = vpop.f32.mrb[16].mxu1 }
0x1f09   :  { %v1881_v54 = vrot.slane %v1876_v53, 3  ;;  %v3229_v56 = vpop.f32.mrb[17].mxu1 }
0x1f0b   :  { %v1883_v57 = vadd.f32 %v1881_v54, %v3791_v30  ;;  %v4051_v54 = vld [vmem:[%s4189_s10] ss:$0 sm:$0xff] }
0x1f0d   :  { %v1891_v58 = vadd.f32 %v3865_v31, %v1883_v57 }
0x1f0f   :  { %v1893_v59 = vsel %vm1892_vm11, %v1891_v58, -inf }
0x1f10   :  { %1894 = vmax.xlane.f32.xlu1 %v1893_v59 }
0x1f9d   :  { %v1895_v51 = vpop.xlane.xlu1 %1894 }
0x1f9e   :  { %v1896_v62 = vsub.f32 %v1891_v58, %v1895_v51 }
0x1fa0   :  { %v1897_v63 = vmul.f32 1.442695, %v1896_v62  ;;  %v2223_v62 = vld [vmem:[%s4181_s2 + $0x8] sm:$0xff] }
0x1fa2   :  { %3516 = vpow2.f32 %v1897_v63 }
0x1fac   :  { %v3517_v0 = vpop.eup %3516 }
0x1fad   :  { %v1899_v2 = vsel %vm1892_vm11, %v3517_v0, 0.0 }
0x1fae   :  { %1900 = vadd.xlane.f32.xlu0 %v1899_v2  ;;  %v2299_v2 = vld [vmem:[%s4185_s6 + $0x8] sm:$0xff] }
0x1fc4   :  { %2079 = vrot.lane.b32.xlu0 %v3797_v43, %s3623_s0 }
0x203b   :  { %v1901_v55 = vpop.xlane.xlu0 %1900 }
0x203c   :  { %3518 = vrcp.f32 %v1901_v55  ;;  %v2300_v55 = vld [vmem:[%s4185_s6 + $0x10] sm:$0xff] }
0x203f   :  { %v2080_v3 = vpop.permute.xlu0 %2079 }
0x2040   :  { %v2082_v4 = vadd.f32 %v2080_v3, %v1876_v53 }
0x2042   :  { %v2084_v6 = vrot.slane %v2082_v4, 3  ;;  %v2301_v4 = vld [vmem:[%s4185_s6 + $0x18] sm:$0xff] }
0x2044   :  { %2093 = vrot.lane.b32.xlu0 %v2084_v6, %s3624_s25 }
0x2046   :  { %v3519_v7 = vpop.eup %3518 }
0x2047   :  { %v1903_v9 = vmul.f32 %v3519_v7, %v3517_v0  ;;  %v2298_v0 = vld [vmem:[%s4185_s6] sm:$0xff] }
0x2048   :  { %v4071_v3 = vpack.c.bf16 %v2299_v2, %v2298_v0 }
0x2049   :  { %v1907_v10 = vrot.slane %v1903_v9, 5 }
0x204b   :  { %3235 = vmatmul.mubr.msk.f32.vlgmr.msra.gmra.mrb[18].mxu0 %vm317_vm5, %v1907_v10 }
0x204c   :  { %3256 = vmatprep.mubr.msk.f32.mxu0 %vm3621_vm0, %v3622_v8 }
0x20b6   :  { %v2094_v25 = vpop.permute.xlu0 %2093 }
0x211e   :  { %v1976_v11 = vpop.f32.mrb[18].mxu0 }
0x211f   :  { %v3236_v12 = vpop.f32.mrb[19].mxu0  ;;  %3246 = vmatmul.mubr.msk.f32.vlgmr.msra.gmra.mrb[18].mxu1 %vm148_vm3, %v1976_v11 }
0x2120   :  { %3263 = vmatprep.mubr.msk.f32.mxu1 %vm3621_vm0, %v3622_v8 }
0x21f2   :  { %v2053_v43 = vpop.f32.mrb[18].mxu1 }
0x21f3   :  { %v2058_v13 = vrot.slane %v2053_v43, 3  ;;  %v3247_v15 = vpop.f32.mrb[19].mxu1 }
0x21f5   :  { %2059 = vrot.lane.b32.xlu1 %v2058_v13, %s3623_s0  ;;  %v4091_v13 = vld [vmem:[%s4188_s9] ss:$0 sm:$0xff] }
0x21f9   :  { %2069 = vrot.lane.b32.xlu1 %v3843_v60, %s3623_s0  ;;  %v2119_v60 = vld [vmem:[%s4184_s5] sm:$0xff] }
0x21fa   :  { %v3420_v32 = vpack.c.bf16 %v2120_v29, %v2119_v60 }
0x21fc   :  { %3421 = vmatpush3.bf16.msra.mxu0 %v3420_v32 }
0x21fd   :  { %3422 = vmatprep.subr.bf16.mxu0 %v3620_v1 }
0x2200   :  { %3424 = vmatpush3.bf16.msra.mxu0 %v3423_v34 }
0x2201   :  { %3428 = vmatprep.subr.bf16.mxu0 %v3620_v1 }
0x2267   :  { %v2060_v16 = vpop.permute.xlu1 %2059 }
0x2268   :  { %v2062_v18 = vadd.f32 %v2060_v16, %v3791_v30 }
0x226b   :  { %v2070_v19 = vpop.permute.xlu1 %2069 }
0x226c   :  { %v2072_v20 = vadd.f32 %v2070_v19, %v2062_v18 }
0x226e   :  { %v2086_v17 = vadd.f32 %v2084_v6, %v2072_v20  ;;  %v3432_v6 = vpack.c.bf16 %v2301_v4, %v2300_v55 }
0x2270   :  { %v2913_v23 = vmul.f32 -1.442695, %v2086_v17 }
0x2272   :  { %3520 = vpow2.f32 %v2913_v23 }
0x227c   :  { %v3521_v21 = vpop.eup %3520 }
0x227d   :  { %v2090_v22 = vadd.f32 1.0, %v3521_v21 }
0x227f   :  { %3522 = vrcp.f32 %v2090_v22 }
0x2289   :  { %v3523_v24 = vpop.eup %3522 }
0x228a   :  { %v2096_v28 = vmul.f32 %v3523_v24, %v2094_v25  ;;  %v2103_v36 = vsub.f32 1.0, %v3523_v24  ;;  %v2111_v39 = vmul.f32 %v3523_v24, %v2109_v37 }
0x228c   :  { %2098 = vrot.lane.b32.xlu1 %v2096_v28, %s3624_s25 }
0x22fe   :  { %v2099_v26 = vpop.permute.xlu1 %2098 }
0x22ff   :  { %v2101_v27 = vadd.f32 %v2099_v26, %v2072_v20 }
0x2301   :  { %3524 = vtanh.f32 %v2101_v27 }
0x230b   :  { %v3525_v35 = vpop.eup %3524 }
0x230c   :  { %2105 = vrot.lane.b32.xlu0 %v3525_v35, %s3625_s27 }
0x237e   :  { %v2106_v38 = vpop.permute.xlu0 %2105 }
0x237f   :  { %v2108_v40 = vmul.f32 %v2106_v38, %v2103_v36 }
0x2381   :  { %v4039_v41 = vadd.f32 %v2111_v39, %v2108_v40 }
0x2383   :  { %v2123_v42 = vrot.slane %v4039_v41, 5  ;;  %v2427_v36 = vrot.slane %v4039_v41, 7 }
0x2385   :  { %2124 = vrot.lane.b32.xlu1 %v2123_v42, %s3624_s25 }
0x23f7   :  { %v2125_v44 = vpop.permute.xlu1 %2124 }
0x23f8   :  { %3257 = vmatmul.mubr.msk.f32.vlgmr.msra.gmra.mrb[20].mxu0 %vm148_vm3, %v2125_v44 }
0x23f9   :  { %3274 = vmatprep.mubr.msk.f32.mxu0 %vm3621_vm0, %v3622_v8  ;;  %3430 = vmatpush3.bf16.msra.mxu0 %v4071_v3 }
0x23fa   :  { %3431 = vmatprep.subr.bf16.mxu0 %v3620_v1 }
0x23fd   :  { %3433 = vmatpush3.bf16.msra.mxu0 %v3432_v6 }
0x23fe   :  { %3440 = vmatprep.subr.bf16.mxu0 %v3620_v1 }
0x24cb   :  { %v2194_v45 = vpop.f32.mrb[20].mxu0 }
0x24cc   :  { %v2199_v47 = vrot.slane %v2194_v45, 2  ;;  %v3258_v48 = vpop.f32.mrb[21].mxu0 }
0x24ce   :  { %v2201_v50 = vadd.f32 %v2199_v47, %v3791_v30 }
0x24d0   :  { %v2209_v52 = vadd.f32 %v3865_v31, %v2201_v50  ;;  %v2222_v31 = vld [vmem:[%s4181_s2] sm:$0xff]  ;;  %v2922_v50 = vld [vmem:[#allocation3] ss:$0 sm:$0xff] }
0x24d1   :  { %v3426_v63 = vpack.c.bf16 %v2223_v62, %v2222_v31 }
0x24d2   :  { %v2211_v53 = vsel %vm2210_vm12, %v2209_v52, -inf }
0x24d3   :  { %2212 = vmax.xlane.f32.xlu0 %v2211_v53  ;;  %3427 = vmatpush3.bf16.msra.mxu1 %v3426_v63 }
0x24d4   :  { %3434 = vmatprep.subr.bf16.mxu1 %v3620_v1 }
0x24e9   :  { %2397 = vrot.lane.b32.xlu0 %v4051_v54, %s3623_s0 }
0x24ed   :  { %2387 = vrot.lane.b32.xlu0 %v4091_v13, %s3623_s0 }
0x2560   :  { %v2213_v56 = vpop.xlane.xlu0 %2212 }
0x2561   :  { %v2214_v57 = vsub.f32 %v2209_v52, %v2213_v56 }
0x2563   :  { %v2215_v58 = vmul.f32 1.442695, %v2214_v57 }
0x2564   :  { %v2398_v15 = vpop.permute.xlu0 %2397 }
0x2565   :  { %3526 = vpow2.f32 %v2215_v58  ;;  %v2400_v18 = vadd.f32 %v2398_v15, %v2194_v45 }
0x2567   :  { %v2402_v17 = vrot.slane %v2400_v18, 2 }
0x2568   :  { %v2388_v21 = vpop.permute.xlu0 %2387 }
0x256f   :  { %v3527_v59 = vpop.eup %3526 }
0x2570   :  { %v2217_v51 = vsel %vm2210_vm12, %v3527_v59, 0.0 }
0x2571   :  { %2218 = vadd.xlane.f32.xlu1 %v2217_v51 }
0x25fe   :  { %v2219_v7 = vpop.xlane.xlu1 %2218 }
0x25ff   :  { %3528 = vrcp.f32 %v2219_v7 }
0x2609   :  { %v3529_v9 = vpop.eup %3528 }
0x260a   :  { %v2221_v10 = vmul.f32 %v3529_v9, %v3527_v59 }
0x260c   :  { %v2225_v11 = vrot.slane %v2221_v10, 6 }
0x260e   :  { %3264 = vmatmul.mubr.msk.f32.vlgmr.msra.gmra.mrb[20].mxu1 %vm317_vm5, %v2225_v11 }
0x260f   :  { %3436 = vmatpush3.bf16.msra.mxu1 %v3420_v32  ;;  %3285 = vmatprep.mubr.msk.f32.mxu1 %vm3621_vm0, %v3622_v8 }
0x2610   :  { %3437 = vmatprep.subr.bf16.mxu1 %v3620_v1 }
0x2613   :  { %3439 = vmatpush3.bf16.msra.mxu1 %v3423_v34 }
0x2614   :  { %3443 = vmatprep.subr.bf16.mxu1 %v3620_v1 }
0x26e1   :  { %v2294_v12 = vpop.f32.mrb[20].mxu1 }
0x26e2   :  { %v3265_v43 = vpop.f32.mrb[21].mxu1  ;;  %3275 = vmatmul.mubr.msk.f32.vlgmr.msra.gmra.mrb[22].mxu0 %vm148_vm3, %v2294_v12 }
0x26e3   :  { %3442 = vmatpush3.bf16.msra.mxu0 %v3426_v63  ;;  %3292 = vmatprep.mubr.msk.f32.mxu0 %vm3621_vm0, %v3622_v8 }
0x26e4   :  { %3449 = vmatprep.subr.bf16.mxu0 %v3620_v1 }
0x27b5   :  { %v2371_v16 = vpop.f32.mrb[22].mxu0 }
0x27b6   :  { %v2376_v19 = vrot.slane %v2371_v16, 2  ;;  %v3276_v20 = vpop.f32.mrb[23].mxu0 }
0x27b8   :  { %2377 = vrot.lane.b32.xlu1 %v2376_v19, %s3623_s0 }
0x27bc   :  { %2411 = vrot.lane.b32.xlu1 %v2402_v17, %s3624_s25 }
0x282a   :  { %v2378_v23 = vpop.permute.xlu1 %2377 }
0x282b   :  { %v2380_v22 = vadd.f32 %v2378_v23, %v3791_v30 }
0x282d   :  { %v2390_v24 = vadd.f32 %v2388_v21, %v2380_v22 }
0x282e   :  { %v2412_v29 = vpop.permute.xlu1 %2411 }
0x282f   :  { %v2404_v25 = vadd.f32 %v2402_v17, %v2390_v24 }
0x2831   :  { %v2920_v28 = vmul.f32 -1.442695, %v2404_v25 }
0x2833   :  { %3530 = vpow2.f32 %v2920_v28  ;;  %v2759_v28 = vld [vmem:[%s4186_s7 + $0x10] sm:$0xff] }
0x283d   :  { %v3531_v26 = vpop.eup %3530 }
0x283e   :  { %v2408_v27 = vadd.f32 1.0, %v3531_v26 }
0x2840   :  { %3532 = vrcp.f32 %v2408_v27 }
0x284a   :  { %v3533_v60 = vpop.eup %3532 }
0x284b   :  { %v2414_v46 = vmul.f32 %v3533_v60, %v2412_v29  ;;  %v2421_v35 = vsub.f32 1.0, %v3533_v60  ;;  %v2429_v38 = vmul.f32 %v3533_v60, %v2427_v36 }
0x284d   :  { %2416 = vrot.lane.b32.xlu0 %v2414_v46, %s3624_s25 }
0x28bf   :  { %v2417_v32 = vpop.permute.xlu0 %2416 }
0x28c0   :  { %v2419_v33 = vadd.f32 %v2417_v32, %v2390_v24 }
0x28c2   :  { %3534 = vtanh.f32 %v2419_v33 }
0x28cc   :  { %v3535_v34 = vpop.eup %3534 }
0x28cd   :  { %2423 = vrot.lane.b32.xlu1 %v3535_v34, %s3625_s27 }
0x293f   :  { %v2424_v37 = vpop.permute.xlu1 %2423 }
0x2940   :  { %v2426_v39 = vmul.f32 %v2424_v37, %v2421_v35 }
0x2942   :  { %v4101_v40 = vadd.f32 %v2429_v38, %v2426_v39 }
0x2944   :  { %v2441_v42 = vrot.slane %v4101_v40, 6  ;;  %v2745_v27 = vrot.slane %v4101_v40, 7 }
0x2946   :  { %2442 = vrot.lane.b32.xlu0 %v2441_v42, %s3624_s25 }
0x29b8   :  { %v2443_v44 = vpop.permute.xlu0 %2442 }
0x29b9   :  { %3286 = vmatmul.mubr.msk.f32.vlgmr.msra.gmra.mrb[22].mxu1 %vm148_vm3, %v2443_v44 }
0x29ba   :  { %3445 = vmatpush3.bf16.msra.mxu1 %v4071_v3  ;;  %3303 = vmatprep.mubr.msk.f32.mxu1 %vm3621_vm0, %v3622_v8 }
0x29bb   :  { %3446 = vmatprep.subr.bf16.mxu1 %v3620_v1 }
0x29be   :  { %3448 = vmatpush3.bf16.msra.mxu1 %v3432_v6 }
0x2a8c   :  { %v2512_v45 = vpop.f32.mrb[22].mxu1 }
0x2a8d   :  { %v2517_v47 = vrot.slane %v2512_v45, 1  ;;  %v3287_v48 = vpop.f32.mrb[23].mxu1 }
0x2a8f   :  { %v2519_v52 = vadd.f32 %v2517_v47, %v3791_v30 }
0x2a91   :  { %v2527_v53 = vadd.f32 %v2922_v50, %v2519_v52 }
0x2a93   :  { %v2529_v56 = vsel %vm2528_vm13, %v2527_v53, -inf }
0x2a94   :  { %2530 = vmax.xlane.f32.xlu1 %v2529_v56 }
0x2b21   :  { %v2531_v57 = vpop.xlane.xlu1 %2530 }
0x2b22   :  { %v2532_v58 = vsub.f32 %v2527_v53, %v2531_v57 }
0x2b24   :  { %v2533_v59 = vmul.f32 1.442695, %v2532_v58 }
0x2b26   :  { %3536 = vpow2.f32 %v2533_v59 }
0x2b30   :  { %v3537_v51 = vpop.eup %3536 }
0x2b31   :  { %v2535_v31 = vsel %vm2528_vm13, %v3537_v51, 0.0 }
0x2b32   :  { %2536 = vadd.xlane.f32.xlu0 %v2535_v31 }
0x2b48   :  { %2715 = vrot.lane.b32.xlu0 %v4051_v54, %s3623_s0 }
0x2bbf   :  { %v2537_v62 = vpop.xlane.xlu0 %2536 }
0x2bc0   :  { %3538 = vrcp.f32 %v2537_v62 }
0x2bc3   :  { %v2716_v63 = vpop.permute.xlu0 %2715 }
0x2bc4   :  { %v2718_v0 = vadd.f32 %v2716_v63, %v2512_v45 }
0x2bc6   :  { %v2720_v2 = vrot.slane %v2718_v0, 1 }
0x2bc8   :  { %2729 = vrot.lane.b32.xlu0 %v2720_v2, %s3624_s25 }
0x2bca   :  { %v3539_v55 = vpop.eup %3538 }
0x2bcb   :  { %v2539_v3 = vmul.f32 %v3539_v55, %v3537_v51 }
0x2bcd   :  { %v2543_v4 = vrot.slane %v2539_v3, 7 }
0x2bcf   :  { %3293 = vmatmul.mubr.msk.f32.vlgmr.msra.gmra.mrb[24].mxu0 %vm317_vm5, %v2543_v4  ;;  %vm2753_vm5 = vcmask 261127  }
0x2bd0   :  { %3314 = vmatprep.mubr.msk.f32.mxu0 %vm3621_vm0, %v3622_v8  ;;  %vm2117_vm0 = vcmask 259077  }
0x2c3a   :  { %v2730_v17 = vpop.permute.xlu0 %2729 }
0x2ca2   :  { %v2612_v6 = vpop.f32.mrb[24].mxu0 }
0x2ca3   :  { %v3294_v7 = vpop.f32.mrb[25].mxu0  ;;  %3304 = vmatmul.mubr.msk.f32.vlgmr.msra.gmra.mrb[24].mxu1 %vm148_vm3, %v2612_v6 }
0x2d76   :  { %v2689_v54 = vpop.f32.mrb[24].mxu1 }
0x2d77   :  { %v2694_v9 = vrot.slane %v2689_v54, 1  ;;  %v3305_v10 = vpop.f32.mrb[25].mxu1 }
0x2d79   :  { %2695 = vrot.lane.b32.xlu1 %v2694_v9, %s3623_s0 }
0x2d7d   :  { %2705 = vrot.lane.b32.xlu1 %v4091_v13, %s3623_s0 }
0x2deb   :  { %v2696_v11 = vpop.permute.xlu1 %2695 }
0x2dec   :  { %v2698_v12 = vadd.f32 %v2696_v11, %v3791_v30 }
0x2def   :  { %v2706_v43 = vpop.permute.xlu1 %2705 }
0x2df0   :  { %v2708_v15 = vadd.f32 %v2706_v43, %v2698_v12 }
0x2df2   :  { %v2722_v16 = vadd.f32 %v2720_v2, %v2708_v15 }
0x2df4   :  { %v2927_v18 = vmul.f32 -1.442695, %v2722_v16 }
0x2df6   :  { %3540 = vpow2.f32 %v2927_v18 }
0x2e00   :  { %v3541_v8 = vpop.eup %3540 }
0x2e01   :  { %v2726_v19 = vadd.f32 1.0, %v3541_v8 }
0x2e03   :  { %3542 = vrcp.f32 %v2726_v19 }
0x2e0d   :  { %v3543_v20 = vpop.eup %3542 }
0x2e0e   :  { %v2732_v23 = vmul.f32 %v3543_v20, %v2730_v17  ;;  %v2739_v26 = vsub.f32 1.0, %v3543_v20  ;;  %v2747_v29 = vmul.f32 %v3543_v20, %v2745_v27 }
0x2e10   :  { %2734 = vrot.lane.b32.xlu1 %v2732_v23, %s3624_s25 }
0x2e14   :  { %842 = vrot.lane.b32.xlu1 %v3891_v14, %s3624_s25  ;;  %v2757_v14 = vld [vmem:[%s4186_s7] sm:$0xff] }
0x2e18   :  { %1478 = vrot.lane.b32.xlu1 %v3961_v61, %s3624_s25  ;;  %v2758_v61 = vld [vmem:[%s4186_s7 + $0x8] sm:$0xff] }
0x2e1c   :  { %2114 = vrot.lane.b32.xlu1 %v4039_v41, %s3624_s25  ;;  %v3450_v41 = vpack.c.bf16 %v2758_v61, %v2757_v14 }
0x2e1e   :  { %3451 = vmatpush3.bf16.msra.mxu0 %v3450_v41 }
0x2e1f   :  { %3452 = vmatprep.subr.bf16.mxu0 %v3620_v1 }
0x2e82   :  { %v2735_v30 = vpop.permute.xlu1 %2734 }
0x2e83   :  { %v2737_v13 = vadd.f32 %v2735_v30, %v2708_v15 }
0x2e85   :  { %3544 = vtanh.f32 %v2737_v13 }
0x2e86   :  { %v843_v21 = vpop.permute.xlu1 %842 }
0x2e87   :  { %846 = vst.msk [vmem:[#allocation2] sm:$0x2] %vm845_vm14, %v843_v21 }
0x2e8a   :  { %v1479_v22 = vpop.permute.xlu1 %1478 }
0x2e8b   :  { %1482 = vst.msk [vmem:[#allocation2] sm:$0x8] %vm1481_vm15, %v1479_v22 }
0x2e8e   :  { %v2115_v24 = vpop.permute.xlu1 %2114 }
0x2e8f   :  { %v3545_v25 = vpop.eup %3544  ;;  %2118 = vst.msk [vmem:[#allocation2] sm:$0x20] %vm2117_vm0, %v2115_v24 }
0x2e90   :  { %2741 = vrot.lane.b32.xlu0 %v3545_v25, %s3625_s27 }
0x2e94   :  { %1160 = vrot.lane.b32.xlu0 %v3926_v5, %s3624_s25  ;;  %v2760_v5 = vld [vmem:[%s4186_s7 + $0x18] sm:$0xff]  ;;  %s3626_s7 = smov [#allocation7]  }
0x2e95   :  { %s2858_s14 = sshll.u32 %s3626_s7, 4  ;;  %s2859_s14 = int_to_ptr.vmem [resolvable:$true] %s2858_s14 }
0x2e96   :  { %s3568_s15 = scalar_lea.vmem %s2859_s14, 16  ;;  %s3572_s5 = scalar_lea.vmem %s2859_s14, 32 }
0x2e97   :  { %p3569_p8 = scmp.ne.s32.totalorder %s2859_s14, %s3568_s15  ;;  %p3573_p9 = scmp.lt.s32.totalorder %s2859_s14, %s2859_s14 }
0x2e98   :  { %1796 = vrot.lane.b32.xlu0 %v3996_v49, %s3624_s25  ;;  %v3453_v49 = vpack.c.bf16 %v2760_v5, %v2759_v28  ;;  %p3574_p10 = scmp.lt.s32.totalorder %s3572_s5, %s3568_s15 }
0x2e9a   :  { %3454 = vmatpush3.bf16.msra.mxu0 %v3453_v49  ;;  %p3575_p11 = por %p3574_p10, %p3573_p9 }
0x2e9c   :  { %2432 = vrot.lane.b32.xlu0 %v4101_v40, %s3624_s25  ;;  %p3576_p12 = pnand %p3575_p11, %p3569_p8 }
0x2f02   :  { %v2742_v60 = vpop.permute.xlu0 %2741 }
0x2f03   :  { %v2744_v46 = vmul.f32 %v2742_v60, %v2739_v26 }
0x2f05   :  { %v2748_v32 = vadd.f32 %v2747_v29, %v2744_v46 }
0x2f06   :  { %v1161_v33 = vpop.permute.xlu0 %1160 }
0x2f07   :  { %1164 = vst.msk [vmem:[#allocation2] sm:$0x4] %vm1163_vm1, %v1161_v33  ;;  %2750 = vrot.lane.b32.xlu1 %v2748_v32, %s3624_s25 }
0x2f0a   :  { %v1797_v34 = vpop.permute.xlu0 %1796 }
0x2f0b   :  { %1800 = vst.msk [vmem:[#allocation2] sm:$0x10] %vm1799_vm2, %v1797_v34 }
0x2f0e   :  { %v2433_v35 = vpop.permute.xlu0 %2432 }
0x2f0f   :  { %2436 = vst.msk [vmem:[#allocation2] sm:$0x40] %vm2435_vm4, %v2433_v35 }
0x2f79   :  { %v2751_v1 = vpop.permute.xlu1 %2750 }
0x2f7a   :  { %2754 = vst.msk [vmem:[#allocation2] sm:$0x80] %vm2753_vm5, %v2751_v1  ;;  %2755 = vst.msk [vmem:[#allocation7 - $0x7] sm:$0x80] %vm2753_vm5, %v2751_v1 }
0x2f81   :  { %v2756_v36 = vld [vmem:[#allocation2] sm:$0xff] }
0x2f82   :  { %3315 = vmatmul.mubr.msk.f32.vlgmr.msra.gmra.mrb[26].mxu0 %vm148_vm3, %v2756_v36 }
0x2f83   :  { %3579 = shalt.err (!%p3576_p12)
}
0x2f84   :  { %s3580_s17 = scalar_lea.hbm %s4192_s13, 16 }
0x2f85   :  { %p3581_p13 = scmp.ne.s32.totalorder %s4192_s13, %s3580_s17  ;;  %p3584_p0 = scmp.lt.u32.totalorder %s3580_s17, %s4192_s13 }
0x2f87   :  { %p3586_p1 = pnand %p3584_p0, %p3581_p13 }
0x2f89   :  { %3589 = shalt.err (!%p3586_p1)
}
0x2f8a   :  { %2861 = dma.vmem_to_hbm [thread:$0]  %s2859_s14, 16, %s4192_s13, [#allocation8]   ;;  %v2928_v37 = vld [vmem:[%s4190_s11] ss:$0 sm:$0xff] }
0x2f8b   :  { %s3627_s23 = smov [#allocation6]  }
0x2f8c   :  { %s2848_s24 = sshll.u32 %s3627_s23, 4  ;;  %s2849_s24 = int_to_ptr.vmem [resolvable:$true] %s2848_s24 }
0x2f8d   :  { %s3590_s2 = scalar_lea.vmem %s2849_s24, 128  ;;  %p3595_p3 = scmp.lt.s32.totalorder %s2849_s24, %s2849_s24 }
0x2f8e   :  { %p3591_p2 = scmp.ne.s32.totalorder %s2849_s24, %s3590_s2  ;;  %p3596_p4 = scmp.lt.s32.totalorder %s3590_s2, %s3590_s2 }
0x2f90   :  { %p3597_p5 = por %p3596_p4, %p3595_p3 }
0x2f92   :  { %p3598_p6 = pnand %p3597_p5, %p3591_p2 }
0x3055   :  { %v2837_v38 = vpop.f32.mrb[26].mxu0 }
0x3056   :  { %v2838_v39 = vadd.f32 %v2928_v37, %v2837_v38  ;;  %v3316_v40 = vpop.f32.mrb[27].mxu0 }
0x3058   :  { %2841 = vst [vmem:[#allocation6] sm:$0xff] %v2838_v39 }
0x3059   :  { %3601 = shalt.err (!%p3598_p6)
}
0x305a   :  { %s3602_s8 = scalar_lea.hbm %s4191_s12, 128 }
0x305b   :  { %p3603_p7 = scmp.ne.s32.totalorder %s4191_s12, %s3602_s8  ;;  %p3606_p8 = scmp.lt.u32.totalorder %s3602_s8, %s4191_s12 }
0x305d   :  { %p3608_p9 = pnand %p3606_p8, %p3603_p7 }
0x305f   :  { %3611 = shalt.err (!%p3608_p9)
}
0x3060   :  { %2851 = dma.vmem_to_hbm [thread:$0]  %s2849_s24, 128, %s4191_s12, [#allocation5]  }
0x3061   :  { %3614 = dma.done.wait [#allocation5], 128  }
0x3062   :  { %3615 = vsyncadd [#allocation5], 4294967168 }
0x3063   :  { %3616 = dma.done.wait [#allocation8], 16  }
0x3064   :  { %3617 = vsyncadd [#allocation8], 4294967280 }
0x3065   :  { %2868 = vsyncpa [#allocation4], 1 }
0x3066   :  { %2869 = vsyncpa [#allocation5], 1 }
0x3067   :  { %2870 = vsyncpa [#allocation8], 1 }

</bundles_post_ra>
